<compile_context>
chip_gen: v6e
topology: v6e:2x2x1
jax: 0.10.0
libtpu: 0.0.40
codegen_flags: <defaults>
</compile_context>

<pallas_src>
import functools
import math

import jax
import jax.numpy as jnp
from jax.experimental import pallas as pl
from jax.experimental.pallas import tpu as pltpu

# ----------------------------- configuration --------------------------------
B = 2                                    # batch
CHS = (16, 32, 64)                       # detector.model[-1].ch  (per-level channels)
SPATIAL = ((16, 16), (8, 8), (4, 4))     # per-level (H, W)
HIDDEN = 64                              # transformer.d_model
EMB = 32                                 # emb_dim
NID = 128                                # dataset_nids (small synthetic)
NA = 3                                   # anchors per level
NC = 1                                   # classes
NO = NC + 5                              # det channels per anchor
NUM_QUERIES = 10
STRIDES = (8.0, 16.0, 32.0)
NUM_GROUPS = 32
EPS_GN = 1e-5
EMB_SCALE = math.sqrt(2) * math.log(NID - 1)
SQRT_NA = math.sqrt(NA)


# --------------------------- parameter init ---------------------------------
def init_params(key):
    params = {"input_proj": [], "id_embed": []}
    for c in CHS:
        key, k1 = jax.random.split(key)
        bound = math.sqrt(6.0 / (c + HIDDEN))                     # xavier_uniform
        params["input_proj"].append({
            "w": jax.random.uniform(k1, (c, HIDDEN), jnp.float32, -bound, bound),
            "b": jnp.zeros((HIDDEN,), jnp.float32),               # init.constant_(bias, 0)
            "gamma": jnp.ones((HIDDEN,), jnp.float32),            # GroupNorm affine
            "beta": jnp.zeros((HIDDEN,), jnp.float32),
        })
        layers = []
        for din, dout in ((c, HIDDEN), (HIDDEN, HIDDEN), (HIDDEN, EMB)):
            key, kw, kb = jax.random.split(key, 3)
            bnd = 1.0 / math.sqrt(din)                            # torch Linear default
            layers.append({
                "w": jax.random.uniform(kw, (din, dout), jnp.float32, -bnd, bnd),
                "b": jax.random.uniform(kb, (dout,), jnp.float32, -bnd, bnd),
            })
        params["id_embed"].append(layers)
    key, kh = jax.random.split(key)
    prior_prob = 0.01
    params["id_head"] = {
        "w": 0.01 * jax.random.normal(kh, (EMB, NID), jnp.float32),      # normal_(std=0.01)
        "b": jnp.full((NID,), -math.log((1 - prior_prob) / prior_prob), jnp.float32),
    }
    return params


def prepare_params(params):
    """One-time packing (constant w.r.t. the forward inputs): concatenate
    input_proj.w with id_embed layer-1 w so the fused kernel's first matmul is
    128 lanes wide, reshape biases to (1, D), build GroupNorm group indicators."""
    cpg = HIDDEN // NUM_GROUPS
    G = (jnp.arange(HIDDEN)[:, None] // cpg ==
         jnp.arange(NUM_GROUPS)[None, :]).astype(jnp.float32)          # (HIDDEN, NG)
    shared = {
        "G": G, "Gt": G.T,
        "wh": params["id_head"]["w"],
        "bh": params["id_head"]["b"].reshape(1, NID),
    }
    levels = []
    for proj, mlp in zip(params["input_proj"], params["id_embed"]):
        levels.append({
            "w1": jnp.concatenate([proj["w"], mlp[0]["w"]], axis=1),   # (Cin, 2*HIDDEN)
            "b1": jnp.concatenate([proj["b"], mlp[0]["b"]]).reshape(1, 2 * HIDDEN),
            "gamma": proj["gamma"].reshape(1, HIDDEN),
            "beta": proj["beta"].reshape(1, HIDDEN),
            "w2": mlp[1]["w"], "b2": mlp[1]["b"].reshape(1, HIDDEN),
            "w3": mlp[2]["w"], "b3": mlp[2]["b"].reshape(1, EMB),
        })
    return levels, shared


# ---------- kernel 1 (per level): fused conv1x1+GN  and  MLP+id_head ---------
def _fused_level_kernel(x_ref, w1_ref, b1_ref, g_ref, gt_ref, gamma_ref, beta_ref,
                        w2_ref, b2_ref, w3_ref, b3_ref, wh_ref, bh_ref,
                        src_ref, feat_ref, logit_ref, *, hw, n_per_group):
    x = x_ref[0]                                                       # (HW, Cin)
    # single 128-lane-wide first matmul: [ input_proj | id_embed layer 1 ]
    y_all = jnp.dot(x, w1_ref[...], preferred_element_type=jnp.float32) + b1_ref[...]
    y = y_all[:, :HIDDEN]                                              # conv1x1 output
    h = jnp.maximum(y_all[:, HIDDEN:], 0.0)                            # relu(MLP layer 1)

    # --- GroupNorm(32): HW-axis reductions routed onto the MXU (ones-row matmuls)
    ones_row = jnp.ones((1, hw), jnp.float32)
    sum_y = jnp.dot(ones_row, y, preferred_element_type=jnp.float32)       # (1, HIDDEN)
    sum_y2 = jnp.dot(ones_row, y * y, preferred_element_type=jnp.float32)  # (1, HIDDEN)
    gsum = jnp.dot(sum_y, g_ref[...], preferred_element_type=jnp.float32)  # (1, NG)
    gss = jnp.dot(sum_y2, g_ref[...], preferred_element_type=jnp.float32)  # (1, NG)
    mean = gsum / n_per_group
    var = gss / n_per_group - mean * mean                              # biased, like torch
    inv = jax.lax.rsqrt(var + EPS_GN)
    mean_c = jnp.dot(mean, gt_ref[...], preferred_element_type=jnp.float32)  # (1, HIDDEN)
    inv_c = jnp.dot(inv, gt_ref[...], preferred_element_type=jnp.float32)
    src_ref[0] = (y - mean_c) * inv_c * gamma_ref[...] + beta_ref[...]

    # --- id_embed MLP layers 2,3 ---------------------------------------------
    h = jnp.maximum(jnp.dot(h, w2_ref[...], preferred_element_type=jnp.float32)
                    + b2_ref[...], 0.0)
    e = jnp.dot(h, w3_ref[...], preferred_element_type=jnp.float32) + b3_ref[...]  # (HW, EMB)
    feat_ref[0] = e

    # torch: F.normalize(x_5d) uses dim=1 (anchor-repeat axis, identical copies)
    # => e / max(sqrt(NA)*|e|, 1e-12)  ==  sign(e)/sqrt(NA)  (eps branch kept exact).
    k = EMB_SCALE / SQRT_NA
    emb = jnp.where(jnp.abs(e) * SQRT_NA > 1e-12,
                    jnp.where(e >= 0.0, k, -k),
                    e * (EMB_SCALE * 1e12))
    logit_ref[0] = jnp.dot(emb, wh_ref[...], preferred_element_type=jnp.float32) + bh_ref[...]


def fused_level(x_nchw, lvl, shared):
    Bb, C, H, W = x_nchw.shape
    HW = H * W
    # single NCHW -> channels-last transpose per level (shared by proj + MLP paths)
    x = jnp.transpose(x_nchw, (0, 2, 3, 1)).reshape(Bb, HW, C)
    kernel = functools.partial(_fused_level_kernel, hw=HW,
                               n_per_group=float(HW * (HIDDEN // NUM_GROUPS)))
    src, feat, logit = pl.pallas_call(
        kernel,
        out_shape=(jax.ShapeDtypeStruct((Bb, HW, HIDDEN), jnp.float32),
                   jax.ShapeDtypeStruct((Bb, HW, EMB), jnp.float32),
                   jax.ShapeDtypeStruct((Bb, HW, NID), jnp.float32)),
        grid=(Bb,),
        in_specs=[
            pl.BlockSpec((1, HW, C), lambda b: (b, 0, 0)),
            pl.BlockSpec((C, 2 * HIDDEN), lambda b: (0, 0)),
            pl.BlockSpec((1, 2 * HIDDEN), lambda b: (0, 0)),
            pl.BlockSpec((HIDDEN, NUM_GROUPS), lambda b: (0, 0)),
            pl.BlockSpec((NUM_GROUPS, HIDDEN), lambda b: (0, 0)),
            pl.BlockSpec((1, HIDDEN), lambda b: (0, 0)),
            pl.BlockSpec((1, HIDDEN), lambda b: (0, 0)),
            pl.BlockSpec((HIDDEN, HIDDEN), lambda b: (0, 0)),
            pl.BlockSpec((1, HIDDEN), lambda b: (0, 0)),
            pl.BlockSpec((HIDDEN, EMB), lambda b: (0, 0)),
            pl.BlockSpec((1, EMB), lambda b: (0, 0)),
            pl.BlockSpec((EMB, NID), lambda b: (0, 0)),
            pl.BlockSpec((1, NID), lambda b: (0, 0)),
        ],
        out_specs=(pl.BlockSpec((1, HW, HIDDEN), lambda b: (b, 0, 0)),
                   pl.BlockSpec((1, HW, EMB), lambda b: (b, 0, 0)),
                   pl.BlockSpec((1, HW, NID), lambda b: (b, 0, 0))),
        # batch axis "parallel": feeds both TensorCores on v7x; on v5e/v6e it is a
        # short serial loop (2 steps/level) which is a small, accepted overhead.
        compiler_params=pltpu.CompilerParams(dimension_semantics=("parallel",)),
    )(x, lvl["w1"], lvl["b1"], shared["G"], shared["Gt"], lvl["gamma"], lvl["beta"],
      lvl["w2"], lvl["b2"], lvl["w3"], lvl["b3"], shared["wh"], shared["bh"])
    return src, feat, logit


# ------------- kernel 2: fused YOLO decode for ALL levels (lane-dense) -------
def _decode_kernel(p_ref, m_ref, a_ref, o_ref):
    # p/m/a/o: (NO, N_total) -- positions on the lane axis, components on sublanes
    s = jax.nn.sigmoid(p_ref[...])
    row = jax.lax.broadcasted_iota(jnp.int32, s.shape, 0)
    is_wh = (row >= 2) & (row < 4)
    # rows 0,1: 2*stride*s + (g-0.5)*stride ; rows 2,3: 4*anchor*s^2 ; rest: s
    o_ref[...] = jnp.where(is_wh, s * s, s) * m_ref[...] + a_ref[...]


def build_decode_tables(anchor_grids, det_shapes, strides):
    """Constant per-column multiplier / offset tables (built once at setup),
    column order matches the transposed det_preds: (level, b, a, y, x)."""
    m_parts, a_parts = [], []
    for anchor_grid, shp, stride in zip(anchor_grids, det_shapes, strides):
        bs, na, ny, nx, no = shp
        n = bs * na * ny * nx
        gyv, gxv = jnp.meshgrid(jnp.arange(ny, dtype=jnp.float32),
                                jnp.arange(nx, dtype=jnp.float32), indexing="ij")
        ax = jnp.broadcast_to(((gxv - 0.5) * stride)[None, None],
                              (bs, na, ny, nx)).reshape(1, n)
        ay = jnp.broadcast_to(((gyv - 0.5) * stride)[None, None],
                              (bs, na, ny, nx)).reshape(1, n)
        anchors = anchor_grid.reshape(na, 2)
        cw = jnp.broadcast_to((4.0 * anchors[:, 0])[None, :, None, None],
                              (bs, na, ny, nx)).reshape(1, n)
        ch = jnp.broadcast_to((4.0 * anchors[:, 1])[None, :, None, None],
                              (bs, na, ny, nx)).reshape(1, n)
        s2 = jnp.full((1, n), 2.0 * stride, jnp.float32)
        m_parts.append(jnp.concatenate(
            [s2, s2, cw, ch, jnp.ones((no - 4, n), jnp.float32)], axis=0))
        a_parts.append(jnp.concatenate(
            [ax, ay, jnp.zeros((no - 2, n), jnp.float32)], axis=0))
    return jnp.concatenate(m_parts, axis=1), jnp.concatenate(a_parts, axis=1)


def decode_all(det_preds, m_tab, a_tab):
    no = det_preds[0].shape[-1]
    # (B,NA,ny,nx,NO) -> (NO, B*NA*ny*nx) per level, concatenated on the lane axis
    p = jnp.concatenate(
        [jnp.transpose(dp, (4, 0, 1, 2, 3)).reshape(no, -1) for dp in det_preds], axis=1)
    n_tot = p.shape[1]
    y = pl.pallas_call(
        _decode_kernel,
        out_shape=jax.ShapeDtypeStruct((no, n_tot), jnp.float32),
        grid=(1,),
        in_specs=[pl.BlockSpec((no, n_tot), lambda i: (0, 0))] * 3,
        out_specs=pl.BlockSpec((no, n_tot), lambda i: (0, 0)),
    )(p, m_tab, a_tab)
    # back to torch's torch.cat(z, 1) layout: (bs, sum_l na*ny*nx, no)
    outs, off = [], 0
    for dp in det_preds:
        bs, na, ny, nx, _ = dp.shape
        n_l = bs * na * ny * nx
        yl = y[:, off:off + n_l].reshape(no, bs, na * ny * nx)
        outs.append(jnp.transpose(yl, (1, 2, 0)))
        off += n_l
    return jnp.concatenate(outs, axis=1)


# ------------------------------ forward --------------------------------------
def yolov5_match_forward(xs, det_preds, level_params, shared, decode_m, decode_a):
    srcs = []
    outputs_id_embeds = []
    outputs_id_features = []
    for l, x in enumerate(xs):
        Bb, C, H, W = x.shape
        src, feats, logits = fused_level(x, level_params[l], shared)
        # out_memory keeps the torch NCHW layout (converted only here, at the end)
        srcs.append(src.reshape(Bb, H, W, HIDDEN).transpose(0, 3, 1, 2))
        # reproduce .unsqueeze(1).repeat(1, na, 1, 1, 1): identical per anchor
        feat_rep = jnp.broadcast_to(feats[:, None], (Bb, NA, H * W, EMB)).reshape(
            Bb, NA * H * W, EMB)                                       # (bs, na*ny*nx, emb)
        logit_rep = jnp.broadcast_to(logits.reshape(Bb, 1, H, W, NID),
                                     (Bb, NA, H, W, NID))              # (bs, na, ny, nx, nID)
        outputs_id_features.append(feat_rep)
        outputs_id_embeds.append(logit_rep)

    out = decode_all(det_preds, decode_m, decode_a)                    # torch.cat(z, 1)
    outputs_id_features = jnp.concatenate(outputs_id_features, axis=1)

    # TODO(synk): non_max_suppression / xyxy2xywh gather is data-dependent host-side
    # post-processing with no clean Pallas equivalent; the per-query slots are the
    # zero-initialized placeholders the torch code also starts from.
    pred_boxes = jnp.zeros((B, NUM_QUERIES, 4), jnp.float32)
    pred_logits = jnp.zeros((B, NUM_QUERIES, 1), jnp.float32)
    out_id_features = jnp.zeros((B, NUM_QUERIES, EMB), jnp.float32)

    # references=None path of the torch module (no transformer / ref_embed branch).
    return {
        "pred_logits": pred_logits,
        "pred_boxes": pred_boxes,
        "id_embeds": outputs_id_embeds,
        "id_features": outputs_id_features,
        "det_out": det_preds,
        "out_memory": srcs,
        "decoded_detections": out,
        "nms_id_features_placeholder": out_id_features,
    }


# -------------------------------- main ---------------------------------------
if __name__ == "__main__":
    key = jax.random.PRNGKey(0)
    key, *ks = jax.random.split(key, 1 + 2 * len(CHS))
    xs, det_preds = [], []
    for l, (c, (h, w)) in enumerate(zip(CHS, SPATIAL)):
        xs.append(jax.random.normal(ks[2 * l], (B, c, h, w), jnp.float32))
        det_preds.append(jax.random.normal(ks[2 * l + 1], (B, NA, h, w, NO), jnp.float32))
    anchor_grids = [
        jnp.array([[10.0, 13.0], [16.0, 30.0], [33.0, 23.0]],
                  dtype=jnp.float32).reshape(1, NA, 1, 1, 2) * (2.0 ** l)
        for l in range(len(CHS))
    ]
    key, kp = jax.random.split(key)
    params = init_params(kp)

    # one-time host-side packing / constant tables (not per-forward work)
    level_params, shared = prepare_params(params)
    decode_m, decode_a = build_decode_tables(
        anchor_grids, [dp.shape for dp in det_preds], STRIDES)

    out = yolov5_match_forward(xs, det_preds, level_params, shared, decode_m, decode_a)
    jax.block_until_ready(out)
    print("KERNEL_OK")
</pallas_src>

<mosaic_0001>
module attributes {stable_mosaic.version = 11 : i64} {
  func.func @_fused_level_kernel(%arg0: i32, %arg1: memref<1x256x16xf32, #tpu.memory_space<vmem>>, %arg2: memref<16x128xf32, #tpu.memory_space<vmem>>, %arg3: memref<1x128xf32, #tpu.memory_space<vmem>>, %arg4: memref<64x32xf32, #tpu.memory_space<vmem>>, %arg5: memref<32x64xf32, #tpu.memory_space<vmem>>, %arg6: memref<1x64xf32, #tpu.memory_space<vmem>>, %arg7: memref<1x64xf32, #tpu.memory_space<vmem>>, %arg8: memref<64x64xf32, #tpu.memory_space<vmem>>, %arg9: memref<1x64xf32, #tpu.memory_space<vmem>>, %arg10: memref<64x32xf32, #tpu.memory_space<vmem>>, %arg11: memref<1x32xf32, #tpu.memory_space<vmem>>, %arg12: memref<32x128xf32, #tpu.memory_space<vmem>>, %arg13: memref<1x128xf32, #tpu.memory_space<vmem>>, %arg14: memref<1x256x64xf32, #tpu.memory_space<vmem>>, %arg15: memref<1x256x32xf32, #tpu.memory_space<vmem>>, %arg16: memref<1x256x128xf32, #tpu.memory_space<vmem>>) attributes {dimension_semantics = [#tpu.dimension_semantics<parallel>], iteration_bounds = array<i64: 2>, scalar_prefetch = 0 : i64, scratch_operands = 0 : i64, tpu.core_type = #tpu.core_type<tc>, window_params = [{transform_indices = @transform_0, window_bounds = array<i64: 1, 256, 16>}, {pipeline_mode = #tpu.pipeline_mode<synchronous>, transform_indices = @transform_1, window_bounds = array<i64: 16, 128>}, {pipeline_mode = #tpu.pipeline_mode<synchronous>, transform_indices = @transform_2, window_bounds = array<i64: 1, 128>}, {pipeline_mode = #tpu.pipeline_mode<synchronous>, transform_indices = @transform_3, window_bounds = array<i64: 64, 32>}, {pipeline_mode = #tpu.pipeline_mode<synchronous>, transform_indices = @transform_4, window_bounds = array<i64: 32, 64>}, {pipeline_mode = #tpu.pipeline_mode<synchronous>, transform_indices = @transform_5, window_bounds = array<i64: 1, 64>}, {pipeline_mode = #tpu.pipeline_mode<synchronous>, transform_indices = @transform_6, window_bounds = array<i64: 1, 64>}, {pipeline_mode = #tpu.pipeline_mode<synchronous>, transform_indices = @transform_7, window_bounds = array<i64: 64, 64>}, {pipeline_mode = #tpu.pipeline_mode<synchronous>, transform_indices = @transform_8, window_bounds = array<i64: 1, 64>}, {pipeline_mode = #tpu.pipeline_mode<synchronous>, transform_indices = @transform_9, window_bounds = array<i64: 64, 32>}, {pipeline_mode = #tpu.pipeline_mode<synchronous>, transform_indices = @transform_10, window_bounds = array<i64: 1, 32>}, {pipeline_mode = #tpu.pipeline_mode<synchronous>, transform_indices = @transform_11, window_bounds = array<i64: 32, 128>}, {pipeline_mode = #tpu.pipeline_mode<synchronous>, transform_indices = @transform_12, window_bounds = array<i64: 1, 128>}, {transform_indices = @transform_13, window_bounds = array<i64: 1, 256, 64>}, {transform_indices = @transform_14, window_bounds = array<i64: 1, 256, 32>}, {transform_indices = @transform_15, window_bounds = array<i64: 1, 256, 128>}]} {
    %c0 = arith.constant 0 : index
    %c0_0 = arith.constant 0 : index
    %c0_1 = arith.constant 0 : index
    %0 = vector.load %arg1[%c0, %c0_0, %c0_1] : memref<1x256x16xf32, #tpu.memory_space<vmem>>, vector<1x256x16xf32>
    %1 = vector.shape_cast %0 : vector<1x256x16xf32> to vector<256x16xf32>
    %c0_2 = arith.constant 0 : index
    %c0_3 = arith.constant 0 : index
    %2 = vector.load %arg2[%c0_2, %c0_3] : memref<16x128xf32, #tpu.memory_space<vmem>>, vector<16x128xf32>
    %cst = arith.constant dense<0.000000e+00> : vector<256x128xf32>
    %3 = tpu.matmul %1, %2, %cst {dimension_numbers = #tpu.dot_dimension_numbers<[1], [0], [0], [1], [0, 0, 1, 1], [], []>} : vector<256x16xf32>, vector<16x128xf32>, vector<256x128xf32> -> vector<256x128xf32>
    %c0_4 = arith.constant 0 : index
    %c0_5 = arith.constant 0 : index
    %4 = vector.load %arg3[%c0_4, %c0_5] : memref<1x128xf32, #tpu.memory_space<vmem>>, vector<1x128xf32>
    %5 = vector.broadcast %4 : vector<1x128xf32> to vector<256x128xf32>
    %6 = arith.addf %3, %5 : vector<256x128xf32>
    %7 = vector.extract_strided_slice %6 {offsets = [0, 0], sizes = [256, 64], strides = [1, 1]} : vector<256x128xf32> to vector<256x64xf32>
    %8 = vector.extract_strided_slice %6 {offsets = [0, 64], sizes = [256, 64], strides = [1, 1]} : vector<256x128xf32> to vector<256x64xf32>
    %cst_6 = arith.constant 0.000000e+00 : f32
    %9 = vector.broadcast %cst_6 : f32 to vector<256x64xf32>
    %10 = arith.maximumf %8, %9 : vector<256x64xf32>
    %cst_7 = arith.constant 1.000000e+00 : f32
    %11 = vector.broadcast %cst_7 : f32 to vector<1x256xf32>
    %cst_8 = arith.constant dense<0.000000e+00> : vector<1x64xf32>
    %12 = tpu.matmul %11, %7, %cst_8 {dimension_numbers = #tpu.dot_dimension_numbers<[1], [0], [0], [1], [0, 0, 1, 1], [], []>} : vector<1x256xf32>, vector<256x64xf32>, vector<1x64xf32> -> vector<1x64xf32>
    %13 = arith.mulf %7, %7 : vector<256x64xf32>
    %cst_9 = arith.constant dense<0.000000e+00> : vector<1x64xf32>
    %14 = tpu.matmul %11, %13, %cst_9 {dimension_numbers = #tpu.dot_dimension_numbers<[1], [0], [0], [1], [0, 0, 1, 1], [], []>} : vector<1x256xf32>, vector<256x64xf32>, vector<1x64xf32> -> vector<1x64xf32>
    %c0_10 = arith.constant 0 : index
    %c0_11 = arith.constant 0 : index
    %15 = vector.load %arg4[%c0_10, %c0_11] : memref<64x32xf32, #tpu.memory_space<vmem>>, vector<64x32xf32>
    %cst_12 = arith.constant dense<0.000000e+00> : vector<1x32xf32>
    %16 = tpu.matmul %12, %15, %cst_12 {dimension_numbers = #tpu.dot_dimension_numbers<[1], [0], [0], [1], [0, 0, 1, 1], [], []>} : vector<1x64xf32>, vector<64x32xf32>, vector<1x32xf32> -> vector<1x32xf32>
    %c0_13 = arith.constant 0 : index
    %c0_14 = arith.constant 0 : index
    %17 = vector.load %arg4[%c0_13, %c0_14] : memref<64x32xf32, #tpu.memory_space<vmem>>, vector<64x32xf32>
    %cst_15 = arith.constant dense<0.000000e+00> : vector<1x32xf32>
    %18 = tpu.matmul %14, %17, %cst_15 {dimension_numbers = #tpu.dot_dimension_numbers<[1], [0], [0], [1], [0, 0, 1, 1], [], []>} : vector<1x64xf32>, vector<64x32xf32>, vector<1x32xf32> -> vector<1x32xf32>
    %cst_16 = arith.constant 5.120000e+02 : f32
    %19 = vector.broadcast %cst_16 : f32 to vector<1x32xf32>
    %20 = arith.divf %16, %19 : vector<1x32xf32>
    %cst_17 = arith.constant 5.120000e+02 : f32
    %21 = vector.broadcast %cst_17 : f32 to vector<1x32xf32>
    %22 = arith.divf %18, %21 : vector<1x32xf32>
    %23 = arith.mulf %20, %20 : vector<1x32xf32>
    %24 = arith.subf %22, %23 : vector<1x32xf32>
    %cst_18 = arith.constant 9.99999974E-6 : f32
    %25 = vector.broadcast %cst_18 : f32 to vector<1x32xf32>
    %26 = arith.addf %24, %25 : vector<1x32xf32>
    %27 = math.rsqrt %26 : vector<1x32xf32>
    %c0_19 = arith.constant 0 : index
    %c0_20 = arith.constant 0 : index
    %28 = vector.load %arg5[%c0_19, %c0_20] : memref<32x64xf32, #tpu.memory_space<vmem>>, vector<32x64xf32>
    %cst_21 = arith.constant dense<0.000000e+00> : vector<1x64xf32>
    %29 = tpu.matmul %20, %28, %cst_21 {dimension_numbers = #tpu.dot_dimension_numbers<[1], [0], [0], [1], [0, 0, 1, 1], [], []>} : vector<1x32xf32>, vector<32x64xf32>, vector<1x64xf32> -> vector<1x64xf32>
    %c0_22 = arith.constant 0 : index
    %c0_23 = arith.constant 0 : index
    %30 = vector.load %arg5[%c0_22, %c0_23] : memref<32x64xf32, #tpu.memory_space<vmem>>, vector<32x64xf32>
    %cst_24 = arith.constant dense<0.000000e+00> : vector<1x64xf32>
    %31 = tpu.matmul %27, %30, %cst_24 {dimension_numbers = #tpu.dot_dimension_numbers<[1], [0], [0], [1], [0, 0, 1, 1], [], []>} : vector<1x32xf32>, vector<32x64xf32>, vector<1x64xf32> -> vector<1x64xf32>
    %32 = vector.broadcast %29 : vector<1x64xf32> to vector<256x64xf32>
    %33 = arith.subf %7, %32 : vector<256x64xf32>
    %34 = vector.broadcast %31 : vector<1x64xf32> to vector<256x64xf32>
    %35 = arith.mulf %33, %34 : vector<256x64xf32>
    %c0_25 = arith.constant 0 : index
    %c0_26 = arith.constant 0 : index
    %36 = vector.load %arg6[%c0_25, %c0_26] : memref<1x64xf32, #tpu.memory_space<vmem>>, vector<1x64xf32>
    %37 = vector.broadcast %36 : vector<1x64xf32> to vector<256x64xf32>
    %38 = arith.mulf %35, %37 : vector<256x64xf32>
    %c0_27 = arith.constant 0 : index
    %c0_28 = arith.constant 0 : index
    %39 = vector.load %arg7[%c0_27, %c0_28] : memref<1x64xf32, #tpu.memory_space<vmem>>, vector<1x64xf32>
    %40 = vector.broadcast %39 : vector<1x64xf32> to vector<256x64xf32>
    %41 = arith.addf %38, %40 : vector<256x64xf32>
    %c0_29 = arith.constant 0 : index
    %c0_30 = arith.constant 0 : index
    %c0_31 = arith.constant 0 : index
    %42 = vector.load %arg14[%c0_29, %c0_30, %c0_31] : memref<1x256x64xf32, #tpu.memory_space<vmem>>, vector<1x256x64xf32>
    %43 = vector.shape_cast %42 : vector<1x256x64xf32> to vector<256x64xf32>
    %44 = vector.shape_cast %41 : vector<256x64xf32> to vector<1x256x64xf32>
    tpu.vector_store %arg14[%c0_29, %c0_30, %c0_31], %44 {strides = array<i32>} : memref<1x256x64xf32, #tpu.memory_space<vmem>>, vector<1x256x64xf32>,
    %c0_32 = arith.constant 0 : index
    %c0_33 = arith.constant 0 : index
    %45 = vector.load %arg8[%c0_32, %c0_33] : memref<64x64xf32, #tpu.memory_space<vmem>>, vector<64x64xf32>
    %cst_34 = arith.constant dense<0.000000e+00> : vector<256x64xf32>
    %46 = tpu.matmul %10, %45, %cst_34 {dimension_numbers = #tpu.dot_dimension_numbers<[1], [0], [0], [1], [0, 0, 1, 1], [], []>} : vector<256x64xf32>, vector<64x64xf32>, vector<256x64xf32> -> vector<256x64xf32>
    %c0_35 = arith.constant 0 : index
    %c0_36 = arith.constant 0 : index
    %47 = vector.load %arg9[%c0_35, %c0_36] : memref<1x64xf32, #tpu.memory_space<vmem>>, vector<1x64xf32>
    %48 = vector.broadcast %47 : vector<1x64xf32> to vector<256x64xf32>
    %49 = arith.addf %46, %48 : vector<256x64xf32>
    %cst_37 = arith.constant 0.000000e+00 : f32
    %50 = vector.broadcast %cst_37 : f32 to vector<256x64xf32>
    %51 = arith.maximumf %49, %50 : vector<256x64xf32>
    %c0_38 = arith.constant 0 : index
    %c0_39 = arith.constant 0 : index
    %52 = vector.load %arg10[%c0_38, %c0_39] : memref<64x32xf32, #tpu.memory_space<vmem>>, vector<64x32xf32>
    %cst_40 = arith.constant dense<0.000000e+00> : vector<256x32xf32>
    %53 = tpu.matmul %51, %52, %cst_40 {dimension_numbers = #tpu.dot_dimension_numbers<[1], [0], [0], [1], [0, 0, 1, 1], [], []>} : vector<256x64xf32>, vector<64x32xf32>, vector<256x32xf32> -> vector<256x32xf32>
    %c0_41 = arith.constant 0 : index
    %c0_42 = arith.constant 0 : index
    %54 = vector.load %arg11[%c0_41, %c0_42] : memref<1x32xf32, #tpu.memory_space<vmem>>, vector<1x32xf32>
    %55 = vector.broadcast %54 : vector<1x32xf32> to vector<256x32xf32>
    %56 = arith.addf %53, %55 : vector<256x32xf32>
    %c0_43 = arith.constant 0 : index
    %c0_44 = arith.constant 0 : index
    %c0_45 = arith.constant 0 : index
    %57 = vector.load %arg15[%c0_43, %c0_44, %c0_45] : memref<1x256x32xf32, #tpu.memory_space<vmem>>, vector<1x256x32xf32>
    %58 = vector.shape_cast %57 : vector<1x256x32xf32> to vector<256x32xf32>
    %59 = vector.shape_cast %56 : vector<256x32xf32> to vector<1x256x32xf32>
    tpu.vector_store %arg15[%c0_43, %c0_44, %c0_45], %59 {strides = array<i32>} : memref<1x256x32xf32, #tpu.memory_space<vmem>>, vector<1x256x32xf32>,
    %60 = math.absf %56 : vector<256x32xf32>
    %cst_46 = arith.constant 1.73205078 : f32
    %61 = vector.broadcast %cst_46 : f32 to vector<256x32xf32>
    %62 = arith.mulf %60, %61 : vector<256x32xf32>
    %cst_47 = arith.constant 9.99999996E-13 : f32
    %63 = vector.broadcast %cst_47 : f32 to vector<256x32xf32>
    %64 = arith.cmpf ogt, %62, %63 : vector<256x32xf32>
    %cst_48 = arith.constant 0.000000e+00 : f32
    %65 = vector.broadcast %cst_48 : f32 to vector<256x32xf32>
    %66 = arith.cmpf oge, %56, %65 : vector<256x32xf32>
    %cst_49 = arith.constant 3.95526218 : f32
    %cst_50 = arith.constant -3.95526218 : f32
    %67 = vector.broadcast %cst_49 : f32 to vector<256x32xf32>
    %68 = vector.broadcast %cst_50 : f32 to vector<256x32xf32>
    %69 = arith.select %66, %67, %68 : vector<256x32xi1>, vector<256x32xf32>
    %cst_51 = arith.constant 6.85071506E+12 : f32
    %70 = vector.broadcast %cst_51 : f32 to vector<256x32xf32>
    %71 = arith.mulf %56, %70 : vector<256x32xf32>
    %72 = arith.select %64, %69, %71 : vector<256x32xi1>, vector<256x32xf32>
    %c0_52 = arith.constant 0 : index
    %c0_53 = arith.constant 0 : index
    %73 = vector.load %arg12[%c0_52, %c0_53] : memref<32x128xf32, #tpu.memory_space<vmem>>, vector<32x128xf32>
    %cst_54 = arith.constant dense<0.000000e+00> : vector<256x128xf32>
    %74 = tpu.matmul %72, %73, %cst_54 {dimension_numbers = #tpu.dot_dimension_numbers<[1], [0], [0], [1], [0, 0, 1, 1], [], []>} : vector<256x32xf32>, vector<32x128xf32>, vector<256x128xf32> -> vector<256x128xf32>
    %c0_55 = arith.constant 0 : index
    %c0_56 = arith.constant 0 : index
    %75 = vector.load %arg13[%c0_55, %c0_56] : memref<1x128xf32, #tpu.memory_space<vmem>>, vector<1x128xf32>
    %76 = vector.broadcast %75 : vector<1x128xf32> to vector<256x128xf32>
    %77 = arith.addf %74, %76 : vector<256x128xf32>
    %c0_57 = arith.constant 0 : index
    %c0_58 = arith.constant 0 : index
    %c0_59 = arith.constant 0 : index
    %78 = vector.load %arg16[%c0_57, %c0_58, %c0_59] : memref<1x256x128xf32, #tpu.memory_space<vmem>>, vector<1x256x128xf32>
    %79 = vector.shape_cast %78 : vector<1x256x128xf32> to vector<256x128xf32>
    %80 = vector.shape_cast %77 : vector<256x128xf32> to vector<1x256x128xf32>
    tpu.vector_store %arg16[%c0_57, %c0_58, %c0_59], %80 {strides = array<i32>} : memref<1x256x128xf32, #tpu.memory_space<vmem>>, vector<1x256x128xf32>,
    return
  }
  func.func @transform_0(%arg0: i32) -> (i32, i32, i32) {
    %c0_i32 = arith.constant 0 : i32
    %c0_i32_0 = arith.constant 0 : i32
    %c0_i32_1 = arith.constant 0 : i32
    return %arg0, %c0_i32, %c0_i32_0 : i32, i32, i32
  }
  func.func @transform_1(%arg0: i32) -> (i32, i32) {
    %c0_i32 = arith.constant 0 : i32
    %c0_i32_0 = arith.constant 0 : i32
    %c0_i32_1 = arith.constant 0 : i32
    return %c0_i32, %c0_i32_0 : i32, i32
  }
  func.func @transform_2(%arg0: i32) -> (i32, i32) {
    %c0_i32 = arith.constant 0 : i32
    %c0_i32_0 = arith.constant 0 : i32
    %c0_i32_1 = arith.constant 0 : i32
    return %c0_i32, %c0_i32_0 : i32, i32
  }
  func.func @transform_3(%arg0: i32) -> (i32, i32) {
    %c0_i32 = arith.constant 0 : i32
    %c0_i32_0 = arith.constant 0 : i32
    %c0_i32_1 = arith.constant 0 : i32
    return %c0_i32, %c0_i32_0 : i32, i32
  }
  func.func @transform_4(%arg0: i32) -> (i32, i32) {
    %c0_i32 = arith.constant 0 : i32
    %c0_i32_0 = arith.constant 0 : i32
    %c0_i32_1 = arith.constant 0 : i32
    return %c0_i32, %c0_i32_0 : i32, i32
  }
  func.func @transform_5(%arg0: i32) -> (i32, i32) {
    %c0_i32 = arith.constant 0 : i32
    %c0_i32_0 = arith.constant 0 : i32
    %c0_i32_1 = arith.constant 0 : i32
    return %c0_i32, %c0_i32_0 : i32, i32
  }
  func.func @transform_6(%arg0: i32) -> (i32, i32) {
    %c0_i32 = arith.constant 0 : i32
    %c0_i32_0 = arith.constant 0 : i32
    %c0_i32_1 = arith.constant 0 : i32
    return %c0_i32, %c0_i32_0 : i32, i32
  }
  func.func @transform_7(%arg0: i32) -> (i32, i32) {
    %c0_i32 = arith.constant 0 : i32
    %c0_i32_0 = arith.constant 0 : i32
    %c0_i32_1 = arith.constant 0 : i32
    return %c0_i32, %c0_i32_0 : i32, i32
  }
  func.func @transform_8(%arg0: i32) -> (i32, i32) {
    %c0_i32 = arith.constant 0 : i32
    %c0_i32_0 = arith.constant 0 : i32
    %c0_i32_1 = arith.constant 0 : i32
    return %c0_i32, %c0_i32_0 : i32, i32
  }
  func.func @transform_9(%arg0: i32) -> (i32, i32) {
    %c0_i32 = arith.constant 0 : i32
    %c0_i32_0 = arith.constant 0 : i32
    %c0_i32_1 = arith.constant 0 : i32
    return %c0_i32, %c0_i32_0 : i32, i32
  }
  func.func @transform_10(%arg0: i32) -> (i32, i32) {
    %c0_i32 = arith.constant 0 : i32
    %c0_i32_0 = arith.constant 0 : i32
    %c0_i32_1 = arith.constant 0 : i32
    return %c0_i32, %c0_i32_0 : i32, i32
  }
  func.func @transform_11(%arg0: i32) -> (i32, i32) {
    %c0_i32 = arith.constant 0 : i32
    %c0_i32_0 = arith.constant 0 : i32
    %c0_i32_1 = arith.constant 0 : i32
    return %c0_i32, %c0_i32_0 : i32, i32
  }
  func.func @transform_12(%arg0: i32) -> (i32, i32) {
    %c0_i32 = arith.constant 0 : i32
    %c0_i32_0 = arith.constant 0 : i32
    %c0_i32_1 = arith.constant 0 : i32
    return %c0_i32, %c0_i32_0 : i32, i32
  }
  func.func @transform_13(%arg0: i32) -> (i32, i32, i32) {
    %c0_i32 = arith.constant 0 : i32
    %c0_i32_0 = arith.constant 0 : i32
    %c0_i32_1 = arith.constant 0 : i32
    return %arg0, %c0_i32, %c0_i32_0 : i32, i32, i32
  }
  func.func @transform_14(%arg0: i32) -> (i32, i32, i32) {
    %c0_i32 = arith.constant 0 : i32
    %c0_i32_0 = arith.constant 0 : i32
    %c0_i32_1 = arith.constant 0 : i32
    return %arg0, %c0_i32, %c0_i32_0 : i32, i32, i32
  }
  func.func @transform_15(%arg0: i32) -> (i32, i32, i32) {
    %c0_i32 = arith.constant 0 : i32
    %c0_i32_0 = arith.constant 0 : i32
    %c0_i32_1 = arith.constant 0 : i32
    return %arg0, %c0_i32, %c0_i32_0 : i32, i32, i32
  }
}

</mosaic_0001>

<bundles_post_ra>
// kernel: tpu_custom_call.1
= control target key start
LH: loop header
LB: loop body
LE: loop exit
PB: predicated region body
PF: predicated region fallthrough
CT: control target
= control target key end

     0   :  { %s5214_s0 = inlined_call_operand.vmem [shape: f32[2,256,16], index: 0, kind: input, shape index: {}]   ;;  %s5215_s1 = inlined_call_operand.vmem [shape: f32[16,128], index: 1, kind: input, shape index: {}]   ;;  %s5216_s2 = inlined_call_operand.vmem [shape: f32[1,128], index: 2, kind: input, shape index: {}]   ;;  %s5217_s3 = inlined_call_operand.vmem [shape: f32[64,32], index: 3, kind: input, shape index: {}]   ;;  %s5218_s4 = inlined_call_operand.vmem [shape: f32[32,64], index: 4, kind: input, shape index: {}]   ;;  %s5219_s5 = inlined_call_operand.vmem [shape: f32[1,64], index: 5, kind: input, shape index: {}]   ;;  %s5220_s6 = inlined_call_operand.vmem [shape: f32[1,64], index: 6, kind: input, shape index: {}]   ;;  %s5221_s7 = inlined_call_operand.vmem [shape: f32[64,64], index: 7, kind: input, shape index: {}]   ;;  %s5222_s8 = inlined_call_operand.vmem [shape: f32[1,64], index: 8, kind: input, shape index: {}]   ;;  %s5223_s9 = inlined_call_operand.vmem [shape: f32[64,32], index: 9, kind: input, shape index: {}]   ;;  %s5224_s10 = inlined_call_operand.vmem [shape: f32[1,32], index: 10, kind: input, shape index: {}]   ;;  %s5225_s11 = inlined_call_operand.vmem [shape: f32[32,128], index: 11, kind: input, shape index: {}]   ;;  %s5226_s12 = inlined_call_operand.vmem [shape: f32[1,128], index: 12, kind: input, shape index: {}]   ;;  %s5227_s13 = inlined_call_operand.vmem [shape: f32[2,256,64], index: 13, kind: output, shape index: {0}]   ;;  %s5228_s14 = inlined_call_operand.vmem [shape: f32[2,256,32], index: 14, kind: output, shape index: {1}]   ;;  %s5229_s15 = inlined_call_operand.hbm [shape: f32[2,256,128], index: 15, kind: output, shape index: {2}]  }
   0x1   :  { %5231 = sst [smem:[#allocation7_spill]] %s5214_s0 }
   0x2   :  { %5232 = sst [smem:[#allocation8_spill]] %s5215_s1 }
   0x3   :  { %5233 = sst [smem:[#allocation9_spill]] %s5216_s2 }
   0x4   :  { %21 = vsyncpa [#allocation3], 0 }
   0x5   :  { %23 = vsyncpa [#allocation3 + $0x1], 0  ;;  %s4018_s18 = smov 0   ;;  %s4020_s19 = smov 0  }
   0x6   :  { %s4022_s20 = smov 0   ;;  %s4024_s21 = smov 0  }
   0x7 LB: > { %5234 = sst [smem:[#allocation5_spill]] %s3924_s20  ;;  %s4039_s22 = sadd.s32 4294967295, %s3928_s21   ;;  %s3928_s21 = sphi %s4024_s21, %s5245_s21   ;;  %s3924_s20 = sphi %s4022_s20, %s5242_s20   ;;  %s3920_s19 = sphi %s4020_s19, %s5244_s19   ;;  %s3916_s18 = sphi %s4018_s18, %s5243_s18  }
   0x8   : > { %s3110_s23 = sadd.s32 4294967294, %s3928_s21   ;;  %s4043_s24 = sadd.s32 1, %s3928_s21  }
   0x9   : > { %s366_s25 = sadd.s32 1, %s3924_s20  ;;  %s363_s26 = ssub.s32 %s3928_s21, %s4043_s24 }
   0xa   : > { %p376_p0 = scmp.ne.s32.totalorder %s3924_s20, %s3920_s19  ;;  %p364_p1 = scmp.eq.s32.totalorder %s363_s26, 0 }
   0xb   : > { %p377_p2 = scmp.eq.s32.totalorder %s4039_s22, 1  ;;  %p382_p3 = scmp.ne.s32.totalorder %s3920_s19, %s3916_s18 }
   0xc   : > { %p383_p4 = scmp.eq.s32.totalorder %s3110_s23, 1  ;;  %p3113_p7 = scmp.ge.s32.totalorder %s3928_s21, 1 }
   0xd   : > { %s4054_s27 = scalar_select %p364_p1, %s3924_s20, %s366_s25  }
   0xe   : > { %p4056_p5 = por %p377_p2, %p376_p0  ;;  %p4060_p6 = por %p383_p4, %p382_p3 }
   0xf   : > { %5235 = sst [smem:[#allocation6_spill]] %s4054_s27  ;;  %p445_p8 = scmp.lt.s32.totalorder %s3928_s21, 3 }
  0x11   : > { %p446_p9 = pnand %p3113_p7, %p445_p8 }
  0x12   : > { %s5238_s1 = sld [smem:[#allocation8_spill]] (!%p446_p9)  ;;  %p503_p10 = scmp.lt.s32.totalorder (!%p446_p9), %s4039_s22, 1 }
  0x13   : > { %449 = sbr.rel (%p446_p9) target bundleno = 1236 (0x4d4), region = 72  ;;  %s5239_s0 = sld [smem:[#allocation7_spill]] (!%p446_p9) }
  0x14   : > { %s5240_s2 = sld [smem:[#allocation9_spill]] (!%p446_p9)  ;;  %s3931_s16 = smov (!%p446_p9), 64  }
  0x15   : > { %s3267_s27 = sshll.u32 (!%p446_p9), %s4039_s22, 12 }
  0x18   : > { %v551_v0 = vld [vmem:[%s5238_s1 + $0x8] sm:$0xff]  ;;  %v550_v1 = vld [vmem:[%s5238_s1] sm:$0xff]  ;;  %s504_s25 = scalar_select %p503_p10, %s4039_s22, 1  ;;  %vm559_vm0 = vcmask 130048   ;;  %v3930_v34 = vmov 1.0   ;;  %vm3933_vm1 = vmmov 0  }
  0x19   : > { %3516 = vmatprep.subr.mxu0 %v551_v0  ;;  %1079 = vmatprep.mubr.f32.mxu1 %v3930_v34  ;;  %vm1093_vm2 = vcmask 523264   ;;  %vm1251_vm3 = vcmask 261120  }
  0x1a   : > { %3517 = vmatpush3.msra.mxu0 %v551_v0  ;;  %s4074_s26 = sshll.u32 %s504_s25, 8  ;;  %v4151_v36 = vld [vmem:[%s5240_s2] ss:$0 sm:$0xff] }
  0x1b   : > { %3518 = vmatprep.subr.mxu0 %v550_v1  ;;  %s4080_s30 = scalar_lea.vmem %s5239_s0, %s4074_s26  ;;  %s4813_s17 = scalar_lea.vmem %s5228_s14, %s4074_s26 }
  0x1c   : > { %3519 = vmatpush3.msra.mxu0 %v550_v1  ;;  %v518_v2 = vld [vmem:[%s4080_s30] sm:$0xff]  ;;  %v519_v3 = vld [vmem:[%s4080_s30 + $0x8] sm:$0xff]  ;;  %v520_v4 = vld [vmem:[%s4080_s30 + $0x10] sm:$0xff] }
  0x1d   : > { %3520 = vmatprep.mubr.msk.f32.mxu0 %vm559_vm0, %v518_v2  ;;  %v521_v5 = vld [vmem:[%s4080_s30 + $0x18] sm:$0xff]  ;;  %v522_v6 = vld [vmem:[%s4080_s30 + $0x20] sm:$0xff]  ;;  %v523_v7 = vld [vmem:[%s4080_s30 + $0x28] sm:$0xff] }
  0x1e   : > { %3521 = vmatmul.mubr.msk.f32.vlgmr.msra.gmra.mxu0 %vm559_vm0, %v519_v3  ;;  %v524_v8 = vld [vmem:[%s4080_s30 + $0x30] sm:$0xff]  ;;  %v525_v9 = vld [vmem:[%s4080_s30 + $0x38] sm:$0xff]  ;;  %v526_v10 = vld [vmem:[%s4080_s30 + $0x40] sm:$0xff] }
  0x1f   : > { %3523 = vmatprep.mubr.msk.f32.mxu0 %vm559_vm0, %v520_v4  ;;  %v527_v11 = vld [vmem:[%s4080_s30 + $0x48] sm:$0xff]  ;;  %v528_v12 = vld [vmem:[%s4080_s30 + $0x50] sm:$0xff]  ;;  %v529_v13 = vld [vmem:[%s4080_s30 + $0x58] sm:$0xff] }
  0x20   : > { %v530_v14 = vld [vmem:[%s4080_s30 + $0x60] sm:$0xff]  ;;  %v531_v15 = vld [vmem:[%s4080_s30 + $0x68] sm:$0xff]  ;;  %v532_v16 = vld [vmem:[%s4080_s30 + $0x70] sm:$0xff] }
  0x21   : > { %v533_v17 = vld [vmem:[%s4080_s30 + $0x78] sm:$0xff]  ;;  %v534_v18 = vld [vmem:[%s4080_s30 + $0x80] sm:$0xff]  ;;  %v535_v19 = vld [vmem:[%s4080_s30 + $0x88] sm:$0xff] }
  0x22   : > { %3524 = vmatmul.mubr.msk.f32.gmra.mxu0 %vm559_vm0, %v521_v5  ;;  %v536_v20 = vld [vmem:[%s4080_s30 + $0x90] sm:$0xff]  ;;  %v537_v21 = vld [vmem:[%s4080_s30 + $0x98] sm:$0xff]  ;;  %v538_v22 = vld [vmem:[%s4080_s30 + $0xa0] sm:$0xff] }
  0x23   : > { %3526 = vmatprep.mubr.msk.f32.mxu0 %vm559_vm0, %v522_v6  ;;  %v539_v23 = vld [vmem:[%s4080_s30 + $0xa8] sm:$0xff]  ;;  %v540_v24 = vld [vmem:[%s4080_s30 + $0xb0] sm:$0xff]  ;;  %v541_v25 = vld [vmem:[%s4080_s30 + $0xb8] sm:$0xff] }
  0x24   : > { %v542_v26 = vld [vmem:[%s4080_s30 + $0xc0] sm:$0xff]  ;;  %v543_v27 = vld [vmem:[%s4080_s30 + $0xc8] sm:$0xff]  ;;  %v544_v28 = vld [vmem:[%s4080_s30 + $0xd0] sm:$0xff] }
  0x25   : > { %v545_v29 = vld [vmem:[%s4080_s30 + $0xd8] sm:$0xff]  ;;  %v546_v30 = vld [vmem:[%s4080_s30 + $0xe0] sm:$0xff]  ;;  %v547_v31 = vld [vmem:[%s4080_s30 + $0xe8] sm:$0xff] }
  0x26   : > { %3527 = vmatmul.mubr.msk.f32.gmra.mxu0 %vm559_vm0, %v523_v7  ;;  %v548_v32 = vld [vmem:[%s4080_s30 + $0xf0] sm:$0xff]  ;;  %v549_v33 = vld [vmem:[%s4080_s30 + $0xf8] sm:$0xff]  ;;  %s4732_s30 = scalar_lea.vmem %s5227_s13, %s4074_s26  ;;  %s500_s26 = sand.u32 1, %s3920_s19  }
  0x27   : > { %3529 = vmatprep.mubr.msk.f32.mxu0 %vm559_vm0, %v524_v8  ;;  %s3114_s23 = sshll.u32 %s500_s26, 8  ;;  %s5174_s22 = scalar_lea.sflag [#allocation3], %s500_s26 }
  0x28   : > { %s5098_s20 = scalar_lea.vmem [#allocation2], %s3114_s23  ;;  %s5165_s23 = scalar_lea.hbm %s5229_s15, %s3267_s27 }
  0x2a   : > { %3530 = vmatmul.mubr.msk.f32.gmra.mxu0 %vm559_vm0, %v525_v9 }
  0x2b   : > { %3532 = vmatprep.mubr.msk.f32.mxu0 %vm559_vm0, %v526_v10 }
  0x2e   : > { %3533 = vmatmul.mubr.msk.f32.gmra.mxu0 %vm559_vm0, %v527_v11 }
  0x2f   : > { %3535 = vmatprep.mubr.msk.f32.mxu0 %vm559_vm0, %v528_v12 }
  0x32   : > { %3536 = vmatmul.mubr.msk.f32.gmra.mxu0 %vm559_vm0, %v529_v13 }
  0x33   : > { %3538 = vmatprep.mubr.msk.f32.mxu0 %vm559_vm0, %v530_v14 }
  0x36   : > { %3539 = vmatmul.mubr.msk.f32.gmra.mxu0 %vm559_vm0, %v531_v15 }
  0x37   : > { %3541 = vmatprep.mubr.msk.f32.mxu0 %vm559_vm0, %v532_v16 }
  0x3a   : > { %3542 = vmatmul.mubr.msk.f32.gmra.mxu0 %vm559_vm0, %v533_v17 }
  0x3b   : > { %3544 = vmatprep.mubr.msk.f32.mxu0 %vm559_vm0, %v534_v18 }
  0x3e   : > { %3545 = vmatmul.mubr.msk.f32.gmra.mxu0 %vm559_vm0, %v535_v19 }
  0x3f   : > { %3547 = vmatprep.mubr.msk.f32.mxu0 %vm559_vm0, %v536_v20 }
  0x42   : > { %3548 = vmatmul.mubr.msk.f32.gmra.mxu0 %vm559_vm0, %v537_v21 }
  0x43   : > { %3550 = vmatprep.mubr.msk.f32.mxu0 %vm559_vm0, %v538_v22 }
  0x46   : > { %3551 = vmatmul.mubr.msk.f32.gmra.mxu0 %vm559_vm0, %v539_v23 }
  0x47   : > { %3553 = vmatprep.mubr.msk.f32.mxu0 %vm559_vm0, %v540_v24 }
  0x4a   : > { %3554 = vmatmul.mubr.msk.f32.gmra.mxu0 %vm559_vm0, %v541_v25 }
  0x4b   : > { %3556 = vmatprep.mubr.msk.f32.mxu0 %vm559_vm0, %v542_v26 }
  0x4e   : > { %3557 = vmatmul.mubr.msk.f32.gmra.mxu0 %vm559_vm0, %v543_v27 }
  0x4f   : > { %3559 = vmatprep.mubr.msk.f32.mxu0 %vm559_vm0, %v544_v28 }
  0x52   : > { %3560 = vmatmul.mubr.msk.f32.gmra.mxu0 %vm559_vm0, %v545_v29 }
  0x53   : > { %3562 = vmatprep.mubr.msk.f32.mxu0 %vm559_vm0, %v546_v30 }
  0x56   : > { %3563 = vmatmul.mubr.msk.f32.gmra.mxu0 %vm559_vm0, %v547_v31 }
  0x57   : > { %3565 = vmatprep.mubr.msk.f32.mxu0 %vm559_vm0, %v548_v32 }
  0x5a   : > { %3566 = vmatmul.mubr.msk.f32.gmra.mxu0 %vm559_vm0, %v549_v33 }
  0x5b   : > { %977 = vmatprep.mubr.f32.mxu0 %v3930_v34 }
  0xde   : > { %v3522_v35 = vpop.f32.mrf.mxu0 }
  0xdf   : > { %v4157_v40 = vadd.f32 %v3522_v35, %v4151_v36 }
  0xe0   : > { %v722_v37 = vpop.f32.mrf.mxu0 }
  0xe1   : > { %v4154_v38 = vadd.f32 %v4151_v36, %v722_v37  ;;  %v882_v47 = vmax.f32 %v4157_v40, 0.0 }
  0xe2   : > { %v3525_v39 = vpop.f32.mrf.mxu0 }
  0xe3   : > { %v881_v41 = vmax.f32 %v4154_v38, 0.0  ;;  %v4165_v45 = vadd.f32 %v3525_v39, %v4151_v36 }
  0xe4   : > { %v732_v42 = vpop.f32.mrf.mxu0 }
  0xe5   : > { %v4161_v43 = vadd.f32 %v4151_v36, %v732_v42  ;;  %1627 = vrot.lane.b32.xlu0 %v881_v41, %s3931_s16  ;;  %v884_v52 = vmax.f32 %v4165_v45, 0.0 }
  0xe6   : > { %v3528_v44 = vpop.f32.mrf.mxu0 }
  0xe7   : > { %v883_v46 = vmax.f32 %v4161_v43, 0.0  ;;  %v4175_v51 = vadd.f32 %v3528_v44, %v4151_v36 }
  0xe8   : > { %v742_v48 = vpop.f32.mrf.mxu0 }
  0xe9   : > { %v4170_v49 = vadd.f32 %v4151_v36, %v742_v48  ;;  %1631 = vrot.lane.b32.xlu1 %v883_v46, %s3931_s16  ;;  %1629 = vrot.lane.b32.xlu0 %v882_v47, %s3931_s16  ;;  %v886_v58 = vmax.f32 %v4175_v51, 0.0 }
  0xea   : > { %v3531_v50 = vpop.f32.mrf.mxu0 }
  0xeb   : > { %v885_v53 = vmax.f32 %v4170_v49, 0.0  ;;  %v4185_v57 = vadd.f32 %v3531_v50, %v4151_v36 }
  0xec   : > { %v752_v54 = vpop.f32.mrf.mxu0 }
  0xed   : > { %v4180_v55 = vadd.f32 %v4151_v36, %v752_v54  ;;  %1633 = vrot.lane.b32.xlu1 %v884_v52, %s3931_s16  ;;  %1635 = vrot.lane.b32.xlu0 %v885_v53, %s3931_s16  ;;  %v888_v0 = vmax.f32 %v4185_v57, 0.0 }
  0xee   : > { %v3534_v56 = vpop.f32.mrf.mxu0 }
  0xef   : > { %v887_v59 = vmax.f32 %v4180_v55, 0.0  ;;  %v4195_v63 = vadd.f32 %v3534_v56, %v4151_v36 }
  0xf0   : > { %v762_v60 = vpop.f32.mrf.mxu0 }
  0xf1   : > { %v4190_v61 = vadd.f32 %v4151_v36, %v762_v60  ;;  %1637 = vrot.lane.b32.xlu1 %v886_v58, %s3931_s16  ;;  %1639 = vrot.lane.b32.xlu0 %v887_v59, %s3931_s16  ;;  %v890_v6 = vmax.f32 %v4195_v63, 0.0 }
  0xf2   : > { %v3537_v62 = vpop.f32.mrf.mxu0 }
  0xf3   : > { %v889_v1 = vmax.f32 %v4190_v61, 0.0  ;;  %v4205_v5 = vadd.f32 %v3537_v62, %v4151_v36 }
  0xf4   : > { %v772_v2 = vpop.f32.mrf.mxu0 }
  0xf5   : > { %v4200_v3 = vadd.f32 %v4151_v36, %v772_v2  ;;  %1641 = vrot.lane.b32.xlu1 %v888_v0, %s3931_s16  ;;  %1643 = vrot.lane.b32.xlu0 %v889_v1, %s3931_s16  ;;  %v892_v12 = vmax.f32 %v4205_v5, 0.0 }
  0xf6   : > { %v3540_v4 = vpop.f32.mrf.mxu0 }
  0xf7   : > { %v891_v7 = vmax.f32 %v4200_v3, 0.0  ;;  %v4215_v11 = vadd.f32 %v3540_v4, %v4151_v36 }
  0xf8   : > { %v782_v8 = vpop.f32.mrf.mxu0 }
  0xf9   : > { %v4210_v9 = vadd.f32 %v4151_v36, %v782_v8  ;;  %1645 = vrot.lane.b32.xlu1 %v890_v6, %s3931_s16  ;;  %1647 = vrot.lane.b32.xlu0 %v891_v7, %s3931_s16  ;;  %v894_v18 = vmax.f32 %v4215_v11, 0.0 }
  0xfa   : > { %v3543_v10 = vpop.f32.mrf.mxu0 }
  0xfb   : > { %v893_v13 = vmax.f32 %v4210_v9, 0.0  ;;  %v4225_v17 = vadd.f32 %v3543_v10, %v4151_v36 }
  0xfc   : > { %v792_v14 = vpop.f32.mrf.mxu0 }
  0xfd   : > { %v4220_v15 = vadd.f32 %v4151_v36, %v792_v14  ;;  %1649 = vrot.lane.b32.xlu1 %v892_v12, %s3931_s16  ;;  %1651 = vrot.lane.b32.xlu0 %v893_v13, %s3931_s16  ;;  %v896_v24 = vmax.f32 %v4225_v17, 0.0 }
  0xfe   : > { %v3546_v16 = vpop.f32.mrf.mxu0 }
  0xff   : > { %v895_v19 = vmax.f32 %v4220_v15, 0.0  ;;  %v4235_v23 = vadd.f32 %v3546_v16, %v4151_v36 }
 0x100   : > { %v802_v20 = vpop.f32.mrf.mxu0 }
 0x101   : > { %v4230_v21 = vadd.f32 %v4151_v36, %v802_v20  ;;  %1653 = vrot.lane.b32.xlu1 %v894_v18, %s3931_s16  ;;  %1655 = vrot.lane.b32.xlu0 %v895_v19, %s3931_s16  ;;  %v898_v30 = vmax.f32 %v4235_v23, 0.0  ;;  %v998_v20 = vmul.f32 %v4225_v17, %v4225_v17 }
 0x102   : > { %v3549_v22 = vpop.f32.mrf.mxu0 }
 0x103   : > { %v897_v25 = vmax.f32 %v4230_v21, 0.0  ;;  %v4245_v29 = vadd.f32 %v3549_v22, %v4151_v36 }
 0x104   : > { %v812_v26 = vpop.f32.mrf.mxu0 }
 0x105   : > { %v4240_v27 = vadd.f32 %v4151_v36, %v812_v26  ;;  %1657 = vrot.lane.b32.xlu1 %v896_v24, %s3931_s16  ;;  %1659 = vrot.lane.b32.xlu0 %v897_v25, %s3931_s16  ;;  %v900_v39 = vmax.f32 %v4245_v29, 0.0  ;;  %v997_v25 = vmul.f32 %v4220_v15, %v4220_v15 }
 0x106   : > { %v3552_v28 = vpop.f32.mrf.mxu0 }
 0x107   : > { %v899_v31 = vmax.f32 %v4240_v27, 0.0  ;;  %v4255_v37 = vadd.f32 %v3552_v28, %v4151_v36  ;;  %v996_v28 = vmul.f32 %v4215_v11, %v4215_v11 }
 0x108   : > { %v822_v32 = vpop.f32.mrf.mxu0 }
 0x109   : > { %v4250_v33 = vadd.f32 %v4151_v36, %v822_v32  ;;  %1661 = vrot.lane.b32.xlu1 %v898_v30, %s3931_s16  ;;  %1663 = vrot.lane.b32.xlu0 %v899_v31, %s3931_s16  ;;  %v902_v48 = vmax.f32 %v4255_v37, 0.0  ;;  %v995_v32 = vmul.f32 %v4210_v9, %v4210_v9 }
 0x10a   : > { %v3555_v35 = vpop.f32.mrf.mxu0 }
 0x10b   : > { %v901_v41 = vmax.f32 %v4250_v33, 0.0  ;;  %v4265_v47 = vadd.f32 %v3555_v35, %v4151_v36 }
 0x10c   : > { %v832_v42 = vpop.f32.mrf.mxu0 }
 0x10d   : > { %v4260_v44 = vadd.f32 %v4151_v36, %v832_v42  ;;  %1665 = vrot.lane.b32.xlu1 %v900_v39, %s3931_s16  ;;  %1667 = vrot.lane.b32.xlu0 %v901_v41, %s3931_s16  ;;  %v904_v58 = vmax.f32 %v4265_v47, 0.0  ;;  %v994_v39 = vmul.f32 %v4205_v5, %v4205_v5  ;;  %v993_v42 = vmul.f32 %v4200_v3, %v4200_v3 }
 0x10e   : > { %v3558_v46 = vpop.f32.mrf.mxu0 }
 0x10f   : > { %v903_v50 = vmax.f32 %v4260_v44, 0.0  ;;  %v4275_v56 = vadd.f32 %v3558_v46, %v4151_v36 }
 0x110   : > { %v842_v52 = vpop.f32.mrf.mxu0 }
 0x111   : > { %v4270_v53 = vadd.f32 %v4151_v36, %v842_v52  ;;  %1669 = vrot.lane.b32.xlu1 %v902_v48, %s3931_s16  ;;  %1671 = vrot.lane.b32.xlu0 %v903_v50, %s3931_s16  ;;  %v906_v2 = vmax.f32 %v4275_v56, 0.0  ;;  %v1008_v46 = vmul.f32 %v4275_v56, %v4275_v56  ;;  %v992_v48 = vmul.f32 %v4195_v63, %v4195_v63 }
 0x112   : > { %v3561_v54 = vpop.f32.mrf.mxu0  ;;  %v991_v52 = vmul.f32 %v4190_v61, %v4190_v61 }
 0x113   : > { %v905_v59 = vmax.f32 %v4270_v53, 0.0  ;;  %v4285_v1 = vadd.f32 %v3561_v54, %v4151_v36  ;;  %v1007_v50 = vmul.f32 %v4270_v53, %v4270_v53  ;;  %v1006_v54 = vmul.f32 %v4265_v47, %v4265_v47 }
 0x114   : > { %v852_v60 = vpop.f32.mrf.mxu0 }
 0x115   : > { %v4280_v62 = vadd.f32 %v4151_v36, %v852_v60  ;;  %1673 = vrot.lane.b32.xlu1 %v904_v58, %s3931_s16  ;;  %1675 = vrot.lane.b32.xlu0 %v905_v59, %s3931_s16  ;;  %v908_v12 = vmax.f32 %v4285_v1, 0.0  ;;  %v1010_v35 = vmul.f32 %v4285_v1, %v4285_v1  ;;  %v990_v58 = vmul.f32 %v4185_v57, %v4185_v57 }
 0x116   : > { %v3564_v0 = vpop.f32.mrf.mxu0  ;;  %v1005_v59 = vmul.f32 %v4260_v44, %v4260_v44  ;;  %v989_v60 = vmul.f32 %v4180_v55, %v4180_v55 }
 0x117   : > { %v907_v4 = vmax.f32 %v4280_v62, 0.0  ;;  %v4300_v14 = vadd.f32 %v3564_v0, %v4151_v36  ;;  %v1009_v41 = vmul.f32 %v4280_v62, %v4280_v62  ;;  %v1004_v0 = vmul.f32 %v4255_v37, %v4255_v37 }
 0x118   : > { %v862_v6 = vpop.f32.mrf.mxu0 }
 0x119   : > { %v4290_v7 = vadd.f32 %v4151_v36, %v862_v6  ;;  %1677 = vrot.lane.b32.xlu1 %v906_v2, %s3931_s16  ;;  %1679 = vrot.lane.b32.xlu0 %v907_v4, %s3931_s16  ;;  %v910_v24 = vmax.f32 %v4300_v14, 0.0  ;;  %v1012_v26 = vmul.f32 %v4300_v14, %v4300_v14  ;;  %v988_v2 = vmul.f32 %v4175_v51, %v4175_v51 }
 0x11a   : > { %v3567_v8 = vpop.f32.mrf.mxu0  ;;  %v1003_v4 = vmul.f32 %v4250_v33, %v4250_v33  ;;  %v987_v6 = vmul.f32 %v4170_v49, %v4170_v49 }
 0x11b   : > { %v4295_v10 = vadd.f32 %v3567_v8, %v4151_v36  ;;  %v909_v13 = vmax.f32 %v4290_v7, 0.0  ;;  %v1011_v30 = vmul.f32 %v4290_v7, %v4290_v7  ;;  %v1002_v8 = vmul.f32 %v4245_v29, %v4245_v29 }
 0x11c   : > { %v872_v16 = vpop.f32.mrf.mxu0 }
 0x11d   : > { %v4303_v18 = vadd.f32 %v4151_v36, %v872_v16  ;;  %3302 = vmatprep.subr.mxu0 %v4295_v10  ;;  %1681 = vrot.lane.b32.xlu1 %v908_v12, %s3931_s16  ;;  %v1014_v19 = vmul.f32 %v4295_v10, %v4295_v10  ;;  %v912_v31 = vmax.f32 %v4295_v10, 0.0  ;;  %v986_v12 = vmul.f32 %v4165_v45, %v4165_v45 }
 0x11e   : > { %1683 = vrot.lane.b32.xlu0 %v909_v13, %s3931_s16  ;;  %3303 = vmatpush3.msra.mxu0 %v4225_v17  ;;  %v1001_v13 = vmul.f32 %v4240_v27, %v4240_v27  ;;  %v985_v16 = vmul.f32 %v4161_v43, %v4161_v43 }
 0x11f   : > { %3304 = vmatprep.subr.mxu0 %v4303_v18  ;;  %3337 = vmatprep.subr.mxu1 %v1014_v19  ;;  %v1013_v36 = vmul.f32 %v4303_v18, %v4303_v18  ;;  %v911_v22 = vmax.f32 %v4303_v18, 0.0  ;;  %v1000_v19 = vmul.f32 %v4235_v23, %v4235_v23 }
 0x120   : > { %3305 = vmatpush3.msra.mxu0 %v4220_v15  ;;  %3338 = vmatpush3.msra.mxu1 %v998_v20  ;;  %v984_v20 = vmul.f32 %v4157_v40, %v4157_v40 }
 0x121   : > { %3306 = vmatprep.subr.mxu0 %v4300_v14  ;;  %3339 = vmatprep.subr.mxu1 %v1013_v36  ;;  %v999_v36 = vmul.f32 %v4230_v21, %v4230_v21 }
 0x122   : > { %1685 = vrot.lane.b32.xlu1 %v910_v24, %s3931_s16  ;;  %1687 = vrot.lane.b32.xlu0 %v911_v22, %s3931_s16  ;;  %v1092_v22 = vld [vmem:[%s5217_s3 + $0x38] sm:$0xff]  ;;  %v983_v24 = vmul.f32 %v4154_v38, %v4154_v38 }
 0x123   : > { %3307 = vmatpush3.msra.mxu0 %v4215_v11  ;;  %3340 = vmatpush3.msra.mxu1 %v997_v25  ;;  %v3932_v25 = vmov 0.0  }
 0x124   : > { %3308 = vmatprep.subr.mxu0 %v4290_v7  ;;  %3341 = vmatprep.subr.mxu1 %v1012_v26  ;;  %v1091_v26 = vld [vmem:[%s5217_s3 + $0x30] sm:$0xff] }
 0x125   : > { %3309 = vmatpush3.msra.mxu0 %v4210_v9  ;;  %3342 = vmatpush3.msra.mxu1 %v996_v28  ;;  %v1090_v28 = vld [vmem:[%s5217_s3 + $0x28] sm:$0xff] }
 0x126   : > { %3310 = vmatprep.subr.mxu0 %v4285_v1  ;;  %3343 = vmatprep.subr.mxu1 %v1011_v30  ;;  %v1089_v30 = vld [vmem:[%s5217_s3 + $0x20] sm:$0xff] }
 0x127   : > { %1689 = vrot.lane.b32.xlu1 %v912_v31, %s3931_s16  ;;  %3311 = vmatpush3.msra.mxu0 %v4205_v5  ;;  %v1087_v31 = vld [vmem:[%s5217_s3 + $0x10] sm:$0xff]  ;;  %s2998_s16 = sshll.u32 %s5098_s20, 4  ;;  %s5167_s16 = int_to_ptr.vmem [resolvable:$true] %s2998_s16 }
 0x128   : > { %3344 = vmatpush3.msra.mxu1 %v995_v32  ;;  %3312 = vmatprep.subr.mxu0 %v4280_v62  ;;  %v1086_v32 = vld [vmem:[%s5217_s3 + $0x8] sm:$0xff]  ;;  %s3868_s25 = scalar_lea.vmem %s5167_s16, 4096 }
 0x129   : > { %3345 = vmatprep.subr.mxu1 %v1010_v35  ;;  %3313 = vmatpush3.msra.mxu0 %v4200_v3  ;;  %v1085_v35 = vld [vmem:[%s5217_s3] sm:$0xff]  ;;  %p3869_p11 = scmp.ne.s32.totalorder %s5167_s16, %s3868_s25 }
 0x12a   : > { %3346 = vmatpush3.msra.mxu1 %v994_v39  ;;  %3314 = vmatprep.subr.mxu0 %v4275_v56  ;;  %v1587_v39 = vld [vmem:[%s5221_s7 + $0x38] sm:$0xff] }
 0x12b   : > { %3347 = vmatprep.subr.mxu1 %v1009_v41  ;;  %3315 = vmatpush3.msra.mxu0 %v4195_v63  ;;  %p3870_p12 = pnand %p3869_p11, %p4056_p5 }
 0x12c   : > { %3348 = vmatpush3.msra.mxu1 %v993_v42  ;;  %3316 = vmatprep.subr.mxu0 %v4270_v53 }
 0x12d   : > { %3349 = vmatprep.subr.mxu1 %v1008_v46  ;;  %3317 = vmatpush3.msra.mxu0 %v4190_v61  ;;  %p3871_p13 = pneg %p3870_p12 }
 0x12e   : > { %3350 = vmatpush3.msra.mxu1 %v992_v48  ;;  %3318 = vmatprep.subr.mxu0 %v4265_v47 }
 0x12f   : > { %3351 = vmatprep.subr.mxu1 %v1007_v50  ;;  %3319 = vmatpush3.msra.mxu0 %v4185_v57 }
 0x130   : > { %3352 = vmatpush3.msra.mxu1 %v991_v52  ;;  %3320 = vmatprep.subr.mxu0 %v4260_v44 }
 0x131   : > { %3353 = vmatprep.subr.mxu1 %v1006_v54  ;;  %3321 = vmatpush3.msra.mxu0 %v4180_v55 }
 0x132   : > { %3354 = vmatpush3.msra.mxu1 %v990_v58  ;;  %3322 = vmatprep.subr.mxu0 %v4255_v37 }
 0x133   : > { %3355 = vmatprep.subr.mxu1 %v1005_v59  ;;  %3323 = vmatpush3.msra.mxu0 %v4175_v51 }
 0x134   : > { %3356 = vmatpush3.msra.mxu1 %v989_v60  ;;  %3324 = vmatprep.subr.mxu0 %v4250_v33  ;;  %v4462_v60 = vld [vmem:[%s5218_s4 + $0x18] sm:$0xff] }
 0x135   : > { %3357 = vmatprep.subr.mxu1 %v1004_v0  ;;  %3325 = vmatpush3.msra.mxu0 %v4170_v49 }
 0x136   : > { %3358 = vmatpush3.msra.mxu1 %v988_v2  ;;  %3326 = vmatprep.subr.mxu0 %v4245_v29 }
 0x137   : > { %3359 = vmatprep.subr.mxu1 %v1003_v4  ;;  %3327 = vmatpush3.msra.mxu0 %v4165_v45  ;;  %v4468_v4 = vld [vmem:[%s5218_s4 + $0x10] sm:$0xff] }
 0x138   : > { %3360 = vmatpush3.msra.mxu1 %v987_v6  ;;  %3328 = vmatprep.subr.mxu0 %v4240_v27 }
 0x139   : > { %3361 = vmatprep.subr.mxu1 %v1002_v8  ;;  %3329 = vmatpush3.msra.mxu0 %v4161_v43  ;;  %v1586_v8 = vld [vmem:[%s5221_s7 + $0x30] sm:$0xff] }
 0x13a   : > { %3362 = vmatpush3.msra.mxu1 %v986_v12  ;;  %3330 = vmatprep.subr.mxu0 %v4235_v23 }
 0x13b   : > { %3363 = vmatprep.subr.mxu1 %v1001_v13  ;;  %3331 = vmatpush3.msra.mxu0 %v4157_v40  ;;  %v1585_v13 = vld [vmem:[%s5221_s7 + $0x28] sm:$0xff] }
 0x13c   : > { %3364 = vmatpush3.msra.mxu1 %v985_v16  ;;  %3332 = vmatprep.subr.mxu0 %v4230_v21 }
 0x13d   : > { %3365 = vmatprep.subr.mxu1 %v1000_v19  ;;  %3333 = vmatpush3.msra.mxu0 %v4154_v38  ;;  %v1584_v19 = vld [vmem:[%s5221_s7 + $0x20] sm:$0xff] }
 0x13e   : > { %3366 = vmatpush3.msra.mxu1 %v984_v20  ;;  %978 = vmatmul.mubr.f32.vlgmr.msra.gmra.mxu0 %v3930_v34  ;;  %v1583_v20 = vld [vmem:[%s5221_s7 + $0x18] sm:$0xff] }
 0x13f   : > { %3367 = vmatprep.subr.mxu1 %v999_v36  ;;  %3568 = vmatprep.subr.mxu0 %v3932_v25 }
 0x140   : > { %3368 = vmatpush3.msra.mxu1 %v983_v24  ;;  %3569 = vmatpush3.msra.mxu0 %v1092_v22 }
 0x141   : > { %1080 = vmatmul.mubr.f32.vlgmr.msra.gmra.mxu1 %v3930_v34  ;;  %3587 = vmatprep.subr.mxu1 %v3932_v25  ;;  %v1088_v34 = vld [vmem:[%s5217_s3 + $0x18] sm:$0xff] }
 0x142   : > { %3570 = vmatprep.subr.mxu0 %v3932_v25  ;;  %3588 = vmatpush3.msra.mxu1 %v1092_v22  ;;  %v1582_v22 = vld [vmem:[%s5221_s7 + $0x10] sm:$0xff] }
 0x143   : > { %3571 = vmatpush3.msra.mxu0 %v1091_v26  ;;  %3589 = vmatprep.subr.mxu1 %v3932_v25 }
 0x144   : > { %3572 = vmatprep.subr.mxu0 %v3932_v25  ;;  %3590 = vmatpush3.msra.mxu1 %v1091_v26  ;;  %v1581_v26 = vld [vmem:[%s5221_s7 + $0x8] sm:$0xff] }
 0x145   : > { %3573 = vmatpush3.msra.mxu0 %v1090_v28  ;;  %3591 = vmatprep.subr.mxu1 %v3932_v25 }
 0x146   : > { %3574 = vmatprep.subr.mxu0 %v3932_v25  ;;  %3592 = vmatpush3.msra.mxu1 %v1090_v28  ;;  %v1580_v28 = vld [vmem:[%s5221_s7] sm:$0xff] }
 0x147   : > { %3575 = vmatpush3.msra.mxu0 %v1089_v30  ;;  %3593 = vmatprep.subr.mxu1 %v3932_v25 }
 0x148   : > { %3576 = vmatprep.subr.mxu0 %v3932_v25  ;;  %3594 = vmatpush3.msra.mxu1 %v1089_v30 }
 0x149   : > { %3577 = vmatpush3.msra.mxu0 %v1088_v34  ;;  %3595 = vmatprep.subr.mxu1 %v3932_v25 }
 0x14a   : > { %3578 = vmatprep.subr.mxu0 %v3932_v25  ;;  %3596 = vmatpush3.msra.mxu1 %v1088_v34 }
 0x14b   : > { %3597 = vmatprep.subr.mxu1 %v3932_v25  ;;  %3579 = vmatpush3.msra.mxu0 %v1087_v31 }
 0x14c   : > { %3598 = vmatpush3.msra.mxu1 %v1087_v31  ;;  %3580 = vmatprep.subr.mxu0 %v3932_v25 }
 0x14d   : > { %3599 = vmatprep.subr.mxu1 %v3932_v25  ;;  %3581 = vmatpush3.msra.mxu0 %v1086_v32 }
 0x14e   : > { %3600 = vmatpush3.msra.mxu1 %v1086_v32  ;;  %3582 = vmatprep.subr.mxu0 %v3932_v25 }
 0x14f   : > { %3601 = vmatprep.subr.mxu1 %v3932_v25  ;;  %3583 = vmatpush3.msra.mxu0 %v1085_v35 }
 0x150   : > { %3584 = vmatprep.mubr.msk.f32.mxu0 %vm3933_vm1, %v3932_v25  ;;  %3602 = vmatpush3.msra.mxu1 %v1085_v35 }
 0x151   : > { %3603 = vmatprep.mubr.msk.f32.mxu1 %vm3933_vm1, %v3932_v25  ;;  %3628 = vmatprep.subr.mxu1 %v1587_v39 }
 0x152   : > { %3606 = vmatprep.subr.mxu0 %v3932_v25 }
 0x157   : > { %v1628_v41 = vpop.permute.xlu0 %1627 }
 0x15b   : > { %v1632_v42 = vpop.permute.xlu1 %1631  ;;  %v1630_v46 = vpop.permute.xlu0 %1629 }
 0x15f   : > { %v1634_v48 = vpop.permute.xlu1 %1633  ;;  %v1636_v52 = vpop.permute.xlu0 %1635 }
 0x163   : > { %v1638_v0 = vpop.permute.xlu1 %1637  ;;  %v1640_v12 = vpop.permute.xlu0 %1639 }
 0x167   : > { %v1642_v16 = vpop.permute.xlu1 %1641  ;;  %v1644_v36 = vpop.permute.xlu0 %1643 }
 0x16b   : > { %v1646_v24 = vpop.permute.xlu1 %1645  ;;  %v1648_v30 = vpop.permute.xlu0 %1647 }
 0x16f   : > { %v1650_v34 = vpop.permute.xlu1 %1649  ;;  %v1652_v31 = vpop.permute.xlu0 %1651 }
 0x173   : > { %v1654_v32 = vpop.permute.xlu1 %1653  ;;  %v1656_v35 = vpop.permute.xlu0 %1655 }
 0x1fe   : > { %v3334_v50 = vpop.f32.mrf.mxu0 }
 0x200   : > { %v3335_v54 = vpop.f32.mrf.mxu0 }
 0x201   : > { %v3336_v58 = vadd.f32 %v3335_v54, %v3334_v50  ;;  %v3369_v59 = vpop.f32.mrf.mxu1 }
 0x203   : > { %v3370_v2 = vpop.f32.mrf.mxu1  ;;  %3585 = vmatmul.mubr.msk.f32.vlgmr.msra.gmra.mxu0 %vm1093_vm2, %v3336_v58 }
 0x204   : > { %v3371_v6 = vadd.f32 %v3370_v2, %v3369_v59  ;;  %3607 = vmatpush3.msra.mxu0 %v4462_v60  ;;  %3614 = vmatprep.mubr.msk.f32.mxu0 %vm3933_vm1, %v3932_v25 }
 0x205   : > { %3608 = vmatprep.subr.mxu0 %v3932_v25 }
 0x206   : > { %3604 = vmatmul.mubr.msk.f32.vlgmr.msra.gmra.mxu1 %vm1093_vm2, %v3371_v6  ;;  %3609 = vmatpush3.msra.mxu0 %v4468_v4  ;;  %v1248_v6 = vld [vmem:[%s5218_s4 + $0x8] sm:$0xff] }
 0x207   : > { %3629 = vmatpush3.msra.mxu1 %v1587_v39  ;;  %3644 = vmatprep.mubr.msk.f32.mxu1 %vm1093_vm2, %v1628_v41  ;;  %v1658_v39 = vpop.permute.xlu1 %1657  ;;  %v1660_v41 = vpop.permute.xlu0 %1659 }
 0x208   : > { %3630 = vmatprep.subr.mxu1 %v1586_v8  ;;  %3610 = vmatprep.subr.mxu0 %v3932_v25 }
 0x209   : > { %3631 = vmatpush3.msra.mxu1 %v1586_v8  ;;  %3611 = vmatpush3.msra.mxu0 %v1248_v6 }
 0x20a   : > { %3632 = vmatprep.subr.mxu1 %v1585_v13  ;;  %3612 = vmatprep.subr.mxu0 %v3932_v25 }
 0x20b   : > { %3633 = vmatpush3.msra.mxu1 %v1585_v13 }
 0x20c   : > { %3634 = vmatprep.subr.mxu1 %v1584_v19 }
 0x20d   : > { %3635 = vmatpush3.msra.mxu1 %v1584_v19 }
 0x20e   : > { %3636 = vmatprep.subr.mxu1 %v1583_v20 }
 0x20f   : > { %3637 = vmatpush3.msra.mxu1 %v1583_v20 }
 0x210   : > { %3638 = vmatprep.subr.mxu1 %v1582_v22 }
 0x211   : > { %3639 = vmatpush3.msra.mxu1 %v1582_v22 }
 0x212   : > { %3640 = vmatprep.subr.mxu1 %v1581_v26 }
 0x213   : > { %3641 = vmatpush3.msra.mxu1 %v1581_v26 }
 0x214   : > { %3642 = vmatprep.subr.mxu1 %v1580_v28 }
 0x215   : > { %3643 = vmatpush3.msra.mxu1 %v1580_v28 }
 0x216   : > { %3645 = vmatmul.mubr.msk.f32.vlgmr.msra.gmra.mxu1 %vm1093_vm2, %v1630_v46  ;;  %v1664_v46 = vpop.permute.xlu0 %1663 }
 0x217   : > { %3647 = vmatprep.mubr.msk.f32.mxu1 %vm1093_vm2, %v1632_v42  ;;  %v1662_v42 = vpop.permute.xlu1 %1661 }
 0x21a   : > { %3648 = vmatmul.mubr.msk.f32.gmra.mxu1 %vm1093_vm2, %v1634_v48  ;;  %v1668_v50 = vpop.permute.xlu0 %1667 }
 0x21b   : > { %3650 = vmatprep.mubr.msk.f32.mxu1 %vm1093_vm2, %v1636_v52  ;;  %v1666_v48 = vpop.permute.xlu1 %1665 }
 0x21e   : > { %3651 = vmatmul.mubr.msk.f32.gmra.mxu1 %vm1093_vm2, %v1638_v0  ;;  %v1672_v54 = vpop.permute.xlu0 %1671 }
 0x21f   : > { %3653 = vmatprep.mubr.msk.f32.mxu1 %vm1093_vm2, %v1640_v12  ;;  %v1670_v52 = vpop.permute.xlu1 %1669  ;;  %v1247_v12 = vld [vmem:[%s5218_s4] sm:$0xff] }
 0x220   : > { %3613 = vmatpush3.msra.mxu0 %v1247_v12 }
 0x221   : > { %3617 = vmatprep.subr.mxu0 %v3932_v25 }
 0x222   : > { %3654 = vmatmul.mubr.msk.f32.gmra.mxu1 %vm1093_vm2, %v1642_v16  ;;  %v1676_v59 = vpop.permute.xlu0 %1675 }
 0x223   : > { %3656 = vmatprep.mubr.msk.f32.mxu1 %vm1093_vm2, %v1644_v36  ;;  %v1674_v58 = vpop.permute.xlu1 %1673 }
 0x226   : > { %3657 = vmatmul.mubr.msk.f32.gmra.mxu1 %vm1093_vm2, %v1646_v24  ;;  %v1680_v2 = vpop.permute.xlu0 %1679 }
 0x227   : > { %3659 = vmatprep.mubr.msk.f32.mxu1 %vm1093_vm2, %v1648_v30  ;;  %v1678_v0 = vpop.permute.xlu1 %1677 }
 0x22a   : > { %3660 = vmatmul.mubr.msk.f32.gmra.mxu1 %vm1093_vm2, %v1650_v34  ;;  %v1684_v13 = vpop.permute.xlu0 %1683 }
 0x22b   : > { %3662 = vmatprep.mubr.msk.f32.mxu1 %vm1093_vm2, %v1652_v31  ;;  %v1682_v8 = vpop.permute.xlu1 %1681 }
 0x22e   : > { %3663 = vmatmul.mubr.msk.f32.gmra.mxu1 %vm1093_vm2, %v1654_v32  ;;  %v1688_v19 = vpop.permute.xlu0 %1687 }
 0x22f   : > { %3665 = vmatprep.mubr.msk.f32.mxu1 %vm1093_vm2, %v1656_v35  ;;  %v1686_v16 = vpop.permute.xlu1 %1685  ;;  %v2019_v35 = vld [vmem:[%s5223_s9 + $0x38] sm:$0xff] }
 0x232   : > { %3666 = vmatmul.mubr.msk.f32.gmra.mxu1 %vm1093_vm2, %v1658_v39  ;;  %v4552_v39 = vld [vmem:[%s5222_s8] ss:$0 sm:$0xff] }
 0x233   : > { %3668 = vmatprep.mubr.msk.f32.mxu1 %vm1093_vm2, %v1660_v41  ;;  %v1690_v20 = vpop.permute.xlu1 %1689 }
 0x236   : > { %3669 = vmatmul.mubr.msk.f32.gmra.mxu1 %vm1093_vm2, %v1662_v42 }
 0x237   : > { %3671 = vmatprep.mubr.msk.f32.mxu1 %vm1093_vm2, %v1664_v46 }
 0x23a   : > { %3672 = vmatmul.mubr.msk.f32.gmra.mxu1 %vm1093_vm2, %v1666_v48  ;;  %v2018_v48 = vld [vmem:[%s5223_s9 + $0x30] sm:$0xff] }
 0x23b   : > { %3674 = vmatprep.mubr.msk.f32.mxu1 %vm1093_vm2, %v1668_v50 }
 0x23e   : > { %3675 = vmatmul.mubr.msk.f32.gmra.mxu1 %vm1093_vm2, %v1670_v52  ;;  %v2017_v52 = vld [vmem:[%s5223_s9 + $0x28] sm:$0xff] }
 0x23f   : > { %3677 = vmatprep.mubr.msk.f32.mxu1 %vm1093_vm2, %v1672_v54 }
 0x242   : > { %3678 = vmatmul.mubr.msk.f32.gmra.mxu1 %vm1093_vm2, %v1674_v58  ;;  %v2016_v58 = vld [vmem:[%s5223_s9 + $0x20] sm:$0xff] }
 0x243   : > { %3680 = vmatprep.mubr.msk.f32.mxu1 %vm1093_vm2, %v1676_v59 }
 0x246   : > { %3681 = vmatmul.mubr.msk.f32.gmra.mxu1 %vm1093_vm2, %v1678_v0  ;;  %v2015_v0 = vld [vmem:[%s5223_s9 + $0x18] sm:$0xff] }
 0x247   : > { %3683 = vmatprep.mubr.msk.f32.mxu1 %vm1093_vm2, %v1680_v2 }
 0x24a   : > { %3684 = vmatmul.mubr.msk.f32.gmra.mxu1 %vm1093_vm2, %v1682_v8 }
 0x24b   : > { %3686 = vmatprep.mubr.msk.f32.mxu1 %vm1093_vm2, %v1684_v13 }
 0x24e   : > { %3687 = vmatmul.mubr.msk.f32.gmra.mxu1 %vm1093_vm2, %v1686_v16 }
 0x24f   : > { %3689 = vmatprep.mubr.msk.f32.mxu1 %vm1093_vm2, %v1688_v19 }
 0x252   : > { %3690 = vmatmul.mubr.msk.f32.gmra.mxu1 %vm1093_vm2, %v1690_v20  ;;  %v2012_v20 = vld [vmem:[%s5223_s9] sm:$0xff] }
 0x2c3   : > { %v1163_v36 = vpop.f32.mrf.mxu0 }
 0x2c4   : > { %v1241_v22 = vmul.f32 0.001953125, %v1163_v36 }
 0x2c5   : > { %v3586_v24 = vpop.f32.mrf.mxu0 }
 0x2c6   : > { %v1243_v26 = vmul.f32 %v1241_v22, %v1241_v22  ;;  %v1236_v28 = vpop.f32.mrf.mxu1  ;;  %3615 = vmatmul.mubr.msk.f32.vlgmr.msra.gmra.mxu0 %vm1251_vm3, %v1241_v22 }
 0x2c7   : > { %v1242_v30 = vmul.f32 0.001953125, %v1236_v28  ;;  %3618 = vmatpush3.msra.mxu0 %v4462_v60  ;;  %3625 = vmatprep.mubr.msk.f32.mxu0 %vm3933_vm1, %v3932_v25 }
 0x2c8   : > { %v3605_v34 = vpop.f32.mrf.mxu1  ;;  %3619 = vmatprep.subr.mxu0 %v3932_v25 }
 0x2c9   : > { %v1244_v31 = vsub.f32 %v1242_v30, %v1243_v26  ;;  %3620 = vmatpush3.msra.mxu0 %v4468_v4 }
 0x2ca   : > { %3621 = vmatprep.subr.mxu0 %v3932_v25 }
 0x2cb   : > { %v1245_v32 = vadd.f32 1e-05, %v1244_v31  ;;  %3622 = vmatpush3.msra.mxu0 %v1248_v6  ;;  %v2014_v6 = vld [vmem:[%s5223_s9 + $0x10] sm:$0xff] }
 0x2cc   : > { %3623 = vmatprep.subr.mxu0 %v3932_v25 }
 0x2cd   : > { %3866 = vrsqrt.f32 %v1245_v32  ;;  %3624 = vmatpush3.msra.mxu0 %v1247_v12  ;;  %v2013_v12 = vld [vmem:[%s5223_s9 + $0x8] sm:$0xff] }
 0x2ce   : > { %3692 = vmatprep.subr.mxu0 %v2019_v35 }
 0x2d6   : > { %v3646_v60 = vpop.f32.mrf.mxu1 }
 0x2d7   : > { %v1827_v13 = vadd.f32 %v3646_v60, %v4552_v39 }
 0x2d8   : > { %v1821_v4 = vpop.f32.mrf.mxu1 }
 0x2d9   : > { %v1822_v41 = vadd.f32 %v4552_v39, %v1821_v4  ;;  %v1981_v22 = vmax.f32 %v1827_v13, 0.0 }
 0x2da   : > { %v3867_v42 = vpop.eup %3866  ;;  %v3649_v46 = vpop.f32.mrf.mxu1 }
 0x2db   : > { %v1980_v50 = vmax.f32 %v1822_v41, 0.0  ;;  %3626 = vmatmul.mubr.msk.f32.vlgmr.msra.gmra.mxu0 %vm1251_vm3, %v3867_v42  ;;  %v1837_v24 = vadd.f32 %v3649_v46, %v4552_v39 }
 0x2dc   : > { %v1831_v25 = vpop.f32.mrf.mxu1  ;;  %3693 = vmatpush3.msra.mxu0 %v2019_v35 }
 0x2dd   : > { %3694 = vmatprep.subr.mxu0 %v2018_v48  ;;  %3708 = vmatprep.mubr.msk.f32.mxu0 %vm1093_vm2, %v1980_v50  ;;  %v1832_v16 = vadd.f32 %v4552_v39, %v1831_v25  ;;  %v1983_v31 = vmax.f32 %v1837_v24, 0.0 }
 0x2de   : > { %v3652_v54 = vpop.f32.mrf.mxu1  ;;  %3695 = vmatpush3.msra.mxu0 %v2018_v48 }
 0x2df   : > { %3696 = vmatprep.subr.mxu0 %v2017_v52  ;;  %v1982_v26 = vmax.f32 %v1832_v16, 0.0  ;;  %v1847_v32 = vadd.f32 %v3652_v54, %v4552_v39 }
 0x2e0   : > { %v1841_v59 = vpop.f32.mrf.mxu1  ;;  %3697 = vmatpush3.msra.mxu0 %v2017_v52 }
 0x2e1   : > { %3698 = vmatprep.subr.mxu0 %v2016_v58  ;;  %v1842_v28 = vadd.f32 %v4552_v39, %v1841_v59  ;;  %v1985_v42 = vmax.f32 %v1847_v32, 0.0 }
 0x2e2   : > { %v3655_v2 = vpop.f32.mrf.mxu1  ;;  %3699 = vmatpush3.msra.mxu0 %v2016_v58 }
 0x2e3   : > { %3700 = vmatprep.subr.mxu0 %v2015_v0  ;;  %v1984_v35 = vmax.f32 %v1842_v28, 0.0  ;;  %v1857_v46 = vadd.f32 %v3655_v2, %v4552_v39 }
 0x2e4   : > { %v1851_v8 = vpop.f32.mrf.mxu1  ;;  %3701 = vmatpush3.msra.mxu0 %v2015_v0 }
 0x2e5   : > { %3702 = vmatprep.subr.mxu0 %v2014_v6  ;;  %v1852_v60 = vadd.f32 %v4552_v39, %v1851_v8  ;;  %v1987_v54 = vmax.f32 %v1857_v46, 0.0 }
 0x2e6   : > { %v3658_v19 = vpop.f32.mrf.mxu1  ;;  %3703 = vmatpush3.msra.mxu0 %v2014_v6 }
 0x2e7   : > { %3704 = vmatprep.subr.mxu0 %v2013_v12  ;;  %v1986_v48 = vmax.f32 %v1852_v60, 0.0  ;;  %v1867_v58 = vadd.f32 %v3658_v19, %v4552_v39 }
 0x2e8   : > { %v1861_v36 = vpop.f32.mrf.mxu1  ;;  %3705 = vmatpush3.msra.mxu0 %v2013_v12 }
 0x2e9   : > { %3706 = vmatprep.subr.mxu0 %v2012_v20  ;;  %v1862_v50 = vadd.f32 %v4552_v39, %v1861_v36  ;;  %v1989_v2 = vmax.f32 %v1867_v58, 0.0 }
 0x2ea   : > { %v3661_v30 = vpop.f32.mrf.mxu1  ;;  %3707 = vmatpush3.msra.mxu0 %v2012_v20 }
 0x2eb   : > { %3709 = vmatmul.mubr.msk.f32.vlgmr.msra.gmra.mxu0 %vm1093_vm2, %v1981_v22  ;;  %v1988_v59 = vmax.f32 %v1862_v50, 0.0  ;;  %v1877_v12 = vadd.f32 %v3661_v30, %v4552_v39 }
 0x2ec   : > { %v1871_v34 = vpop.f32.mrf.mxu1  ;;  %3711 = vmatprep.mubr.msk.f32.mxu0 %vm1093_vm2, %v1982_v26 }
 0x2ed   : > { %v1872_v0 = vadd.f32 %v4552_v39, %v1871_v34  ;;  %v1991_v19 = vmax.f32 %v1877_v12, 0.0 }
 0x2ee   : > { %v3664_v4 = vpop.f32.mrf.mxu1 }
 0x2ef   : > { %3712 = vmatmul.mubr.msk.f32.gmra.mxu0 %vm1093_vm2, %v1983_v31  ;;  %v1990_v13 = vmax.f32 %v1872_v0, 0.0  ;;  %v1887_v22 = vadd.f32 %v3664_v4, %v4552_v39 }
 0x2f0   : > { %v1881_v41 = vpop.f32.mrf.mxu1  ;;  %3714 = vmatprep.mubr.msk.f32.mxu0 %vm1093_vm2, %v1984_v35 }
 0x2f1   : > { %v1882_v16 = vadd.f32 %v4552_v39, %v1881_v41  ;;  %v1993_v30 = vmax.f32 %v1887_v22, 0.0 }
 0x2f2   : > { %v3667_v25 = vpop.f32.mrf.mxu1 }
 0x2f3   : > { %3715 = vmatmul.mubr.msk.f32.gmra.mxu0 %vm1093_vm2, %v1985_v42  ;;  %v1992_v24 = vmax.f32 %v1882_v16, 0.0  ;;  %v1897_v31 = vadd.f32 %v3667_v25, %v4552_v39 }
 0x2f4   : > { %v1891_v52 = vpop.f32.mrf.mxu1  ;;  %3717 = vmatprep.mubr.msk.f32.mxu0 %vm1093_vm2, %v1986_v48 }
 0x2f5   : > { %v1892_v26 = vadd.f32 %v4552_v39, %v1891_v52  ;;  %v1995_v4 = vmax.f32 %v1897_v31, 0.0 }
 0x2f6   : > { %v3670_v6 = vpop.f32.mrf.mxu1 }
 0x2f7   : > { %3718 = vmatmul.mubr.msk.f32.gmra.mxu0 %vm1093_vm2, %v1987_v54  ;;  %v1994_v32 = vmax.f32 %v1892_v26, 0.0  ;;  %v1907_v42 = vadd.f32 %v3670_v6, %v4552_v39 }
 0x2f8   : > { %v1901_v8 = vpop.f32.mrf.mxu1  ;;  %3720 = vmatprep.mubr.msk.f32.mxu0 %vm1093_vm2, %v1988_v59 }
 0x2f9   : > { %v1902_v35 = vadd.f32 %v4552_v39, %v1901_v8  ;;  %v1997_v25 = vmax.f32 %v1907_v42, 0.0 }
 0x2fa   : > { %v3673_v20 = vpop.f32.mrf.mxu1 }
 0x2fb   : > { %3721 = vmatmul.mubr.msk.f32.gmra.mxu0 %vm1093_vm2, %v1989_v2  ;;  %v1996_v46 = vmax.f32 %v1902_v35, 0.0  ;;  %v1917_v54 = vadd.f32 %v3673_v20, %v4552_v39  ;;  %v2607_v20 = vld [vmem:[%s5225_s11 + $0x18] sm:$0xff] }
 0x2fc   : > { %v1911_v36 = vpop.f32.mrf.mxu1  ;;  %3723 = vmatprep.mubr.msk.f32.mxu0 %vm1093_vm2, %v1990_v13  ;;  %3812 = vmatprep.subr.mxu1 %v2607_v20 }
 0x2fd   : > { %v1912_v48 = vadd.f32 %v4552_v39, %v1911_v36  ;;  %v1999_v6 = vmax.f32 %v1917_v54, 0.0  ;;  %3756 = vmatprep.subr.mxu0 %v2607_v20  ;;  %3816 = vmatpush3.msra.mxu1 %v2607_v20 }
 0x2fe   : > { %v3676_v28 = vpop.f32.mrf.mxu1  ;;  %3757 = vmatpush3.msra.mxu0 %v2607_v20 }
 0x2ff   : > { %3724 = vmatmul.mubr.msk.f32.gmra.mxu0 %vm1093_vm2, %v1991_v19  ;;  %v1998_v58 = vmax.f32 %v1912_v48, 0.0  ;;  %v1927_v2 = vadd.f32 %v3676_v28, %v4552_v39 }
 0x300   : > { %v1921_v34 = vpop.f32.mrf.mxu1  ;;  %3726 = vmatprep.mubr.msk.f32.mxu0 %vm1093_vm2, %v1992_v24 }
 0x301   : > { %v1922_v59 = vadd.f32 %v4552_v39, %v1921_v34  ;;  %v2001_v36 = vmax.f32 %v1927_v2, 0.0 }
 0x302   : > { %v3679_v60 = vpop.f32.mrf.mxu1 }
 0x303   : > { %3727 = vmatmul.mubr.msk.f32.gmra.mxu0 %vm1093_vm2, %v1993_v30  ;;  %v2000_v12 = vmax.f32 %v1922_v59, 0.0  ;;  %v1937_v19 = vadd.f32 %v3679_v60, %v4552_v39 }
 0x304   : > { %v1931_v41 = vpop.f32.mrf.mxu1  ;;  %3729 = vmatprep.mubr.msk.f32.mxu0 %vm1093_vm2, %v1994_v32 }
 0x305   : > { %v1932_v13 = vadd.f32 %v4552_v39, %v1931_v41  ;;  %v2003_v28 = vmax.f32 %v1937_v19, 0.0 }
 0x306   : > { %v3682_v50 = vpop.f32.mrf.mxu1 }
 0x307   : > { %3730 = vmatmul.mubr.msk.f32.gmra.mxu0 %vm1093_vm2, %v1995_v4  ;;  %v2002_v22 = vmax.f32 %v1932_v13, 0.0  ;;  %v1947_v34 = vadd.f32 %v3682_v50, %v4552_v39 }
 0x308   : > { %v1941_v52 = vpop.f32.mrf.mxu1  ;;  %3732 = vmatprep.mubr.msk.f32.mxu0 %vm1093_vm2, %v1996_v46 }
 0x309   : > { %v1942_v24 = vadd.f32 %v4552_v39, %v1941_v52  ;;  %v2005_v35 = vmax.f32 %v1947_v34, 0.0 }
 0x30a   : > { %v3685_v0 = vpop.f32.mrf.mxu1 }
 0x30b   : > { %3733 = vmatmul.mubr.msk.f32.gmra.mxu0 %vm1093_vm2, %v1997_v25  ;;  %v2004_v30 = vmax.f32 %v1942_v24, 0.0  ;;  %v1957_v60 = vadd.f32 %v3685_v0, %v4552_v39  ;;  %v2606_v0 = vld [vmem:[%s5225_s11 + $0x10] sm:$0xff] }
 0x30c   : > { %v1951_v8 = vpop.f32.mrf.mxu1  ;;  %3735 = vmatprep.mubr.msk.f32.mxu0 %vm1093_vm2, %v1998_v58  ;;  %3813 = vmatprep.subr.mxu1 %v2606_v0 }
 0x30d   : > { %v1952_v31 = vadd.f32 %v4552_v39, %v1951_v8  ;;  %v2007_v46 = vmax.f32 %v1957_v60, 0.0  ;;  %3758 = vmatprep.subr.mxu0 %v2606_v0  ;;  %v2605_v8 = vld [vmem:[%s5225_s11 + $0x8] sm:$0xff]  ;;  %3817 = vmatpush3.msra.mxu1 %v2606_v0 }
 0x30e   : > { %v3688_v16 = vpop.f32.mrf.mxu1  ;;  %3759 = vmatpush3.msra.mxu0 %v2606_v0  ;;  %3814 = vmatprep.subr.mxu1 %v2605_v8 }
 0x30f   : > { %3736 = vmatmul.mubr.msk.f32.gmra.mxu0 %vm1093_vm2, %v1999_v6  ;;  %v2006_v41 = vmax.f32 %v1952_v31, 0.0  ;;  %v1967_v48 = vadd.f32 %v3688_v16, %v4552_v39  ;;  %3760 = vmatprep.subr.mxu0 %v2605_v8  ;;  %v1398_v6 = vlaneseq }
 0x310   : > { %3738 = vmatprep.mubr.msk.f32.mxu0 %vm1093_vm2, %v2000_v12  ;;  %v1961_v26 = vpop.f32.mrf.mxu1  ;;  %3761 = vmatpush3.msra.mxu0 %v2605_v8 }
 0x311   : > { %v1962_v4 = vadd.f32 %v4552_v39, %v1961_v26  ;;  %v2009_v25 = vmax.f32 %v1967_v48, 0.0  ;;  %3818 = vmatpush3.msra.mxu1 %v2605_v8  ;;  %v1399_v13 = vshrl.u32 %v1398_v6, 7 }
 0x312   : > { %v3691_v32 = vpop.f32.mrf.mxu1 }
 0x313   : > { %3739 = vmatmul.mubr.msk.f32.gmra.mxu0 %vm1093_vm2, %v2001_v36  ;;  %v2008_v50 = vmax.f32 %v1962_v4, 0.0  ;;  %v1977_v54 = vadd.f32 %v3691_v32, %v4552_v39  ;;  %v1400_v16 = vsub.s32 0, %v1399_v13 }
 0x314   : > { %3741 = vmatprep.mubr.msk.f32.mxu0 %vm1093_vm2, %v2002_v22  ;;  %v1971_v42 = vpop.f32.mrf.mxu1 }
 0x315   : > { %v1972_v52 = vadd.f32 %v4552_v39, %v1971_v42  ;;  %v2011_v59 = vmax.f32 %v1977_v54, 0.0  ;;  %v2604_v39 = vld [vmem:[%s5225_s11] sm:$0xff] }
 0x316   : > { %3762 = vmatprep.subr.mxu0 %v2604_v39  ;;  %3815 = vmatprep.subr.mxu1 %v2604_v39 }
 0x317   : > { %3742 = vmatmul.mubr.msk.f32.gmra.mxu0 %vm1093_vm2, %v2003_v28  ;;  %v2010_v58 = vmax.f32 %v1972_v52, 0.0  ;;  %3819 = vmatpush3.msra.mxu1 %v2604_v39 }
 0x318   : > { %3744 = vmatprep.mubr.msk.f32.mxu0 %vm1093_vm2, %v2004_v30  ;;  %3763 = vmatpush3.msra.mxu0 %v2604_v39 }
 0x31b   : > { %3745 = vmatmul.mubr.msk.f32.gmra.mxu0 %vm1093_vm2, %v2005_v35 }
 0x31c   : > { %3747 = vmatprep.mubr.msk.f32.mxu0 %vm1093_vm2, %v2006_v41 }
 0x31f   : > { %3748 = vmatmul.mubr.msk.f32.gmra.mxu0 %vm1093_vm2, %v2007_v46 }
 0x320   : > { %3750 = vmatprep.mubr.msk.f32.mxu0 %vm1093_vm2, %v2008_v50 }
 0x323   : > { %3751 = vmatmul.mubr.msk.f32.gmra.mxu0 %vm1093_vm2, %v2009_v25 }
 0x324   : > { %3753 = vmatprep.mubr.msk.f32.mxu0 %vm1093_vm2, %v2010_v58 }
 0x327   : > { %3754 = vmatmul.mubr.msk.f32.gmra.mxu0 %vm1093_vm2, %v2011_v59 }
 0x386   : > { %v1321_v2 = vpop.f32.mrf.mxu0 }
 0x387   : > { %v4652_v20 = vrot.slane %v1321_v2, %v1400_v16  ;;  %v3158_v2 = vld [vmem:[%s5219_s5] ss:$0 sm:$0xff] }
 0x388   : > { %v3616_v12 = vpop.f32.mrf.mxu0 }
 0x389   : > { %v1402_v36 = vsub.f32 %v4154_v38, %v4652_v20  ;;  %v1403_v19 = vsub.f32 %v4157_v40, %v4652_v20  ;;  %v1404_v22 = vsub.f32 %v4161_v43, %v4652_v20  ;;  %v1405_v24 = vsub.f32 %v4165_v45, %v4652_v20 }
 0x38a   : > { %v1406_v26 = vsub.f32 %v4170_v49, %v4652_v20  ;;  %v1407_v28 = vsub.f32 %v4175_v51, %v4652_v20  ;;  %v1408_v34 = vsub.f32 %v4180_v55, %v4652_v20  ;;  %v1409_v38 = vsub.f32 %v4185_v57, %v4652_v20 }
 0x38b   : > { %v1410_v40 = vsub.f32 %v4190_v61, %v4652_v20  ;;  %v1411_v43 = vsub.f32 %v4195_v63, %v4652_v20  ;;  %v1412_v45 = vsub.f32 %v4200_v3, %v4652_v20  ;;  %v1413_v49 = vsub.f32 %v4205_v5, %v4652_v20 }
 0x38c   : > { %v1414_v51 = vsub.f32 %v4210_v9, %v4652_v20  ;;  %v1415_v55 = vsub.f32 %v4215_v11, %v4652_v20  ;;  %v1416_v57 = vsub.f32 %v4220_v15, %v4652_v20  ;;  %v1417_v61 = vsub.f32 %v4225_v17, %v4652_v20 }
 0x38d   : > { %v1418_v63 = vsub.f32 %v4230_v21, %v4652_v20  ;;  %v1419_v3 = vsub.f32 %v4235_v23, %v4652_v20  ;;  %v1420_v5 = vsub.f32 %v4240_v27, %v4652_v20  ;;  %v1421_v9 = vsub.f32 %v4245_v29, %v4652_v20 }
 0x38e   : > { %v1422_v11 = vsub.f32 %v4250_v33, %v4652_v20  ;;  %v1423_v15 = vsub.f32 %v4255_v37, %v4652_v20  ;;  %v1424_v17 = vsub.f32 %v4260_v44, %v4652_v20  ;;  %v1425_v21 = vsub.f32 %v4265_v47, %v4652_v20 }
 0x38f   : > { %v1426_v23 = vsub.f32 %v4270_v53, %v4652_v20  ;;  %v1427_v27 = vsub.f32 %v4275_v56, %v4652_v20  ;;  %v1428_v29 = vsub.f32 %v4280_v62, %v4652_v20  ;;  %v1429_v33 = vsub.f32 %v4285_v1, %v4652_v20 }
 0x390   : > { %v1430_v44 = vsub.f32 %v4290_v7, %v4652_v20  ;;  %v1431_v47 = vsub.f32 %v4300_v14, %v4652_v20  ;;  %v1432_v53 = vsub.f32 %v4303_v18, %v4652_v20  ;;  %v1433_v31 = vsub.f32 %v4295_v10, %v4652_v20 }
 0x39b   : > { %v1394_v30 = vpop.f32.mrf.mxu0 }
 0x39c   : > { %v1437_v37 = vrot.slane %v1394_v30, %v1400_v16 }
 0x39d   : > { %v3627_v56 = vpop.f32.mrf.mxu0 }
 0x39e   : > { %v1438_v32 = vmul.f32 %v1437_v37, %v1402_v36  ;;  %v1439_v35 = vmul.f32 %v1437_v37, %v1403_v19  ;;  %v1440_v62 = vmul.f32 %v1437_v37, %v1404_v22  ;;  %v1441_v60 = vmul.f32 %v1437_v37, %v1405_v24 }
 0x39f   : > { %v1442_v41 = vmul.f32 %v1437_v37, %v1406_v26  ;;  %v1443_v1 = vmul.f32 %v1437_v37, %v1407_v28  ;;  %v1444_v4 = vmul.f32 %v1437_v37, %v1408_v34  ;;  %v1445_v42 = vmul.f32 %v1437_v37, %v1409_v38 }
 0x3a0   : > { %v1446_v46 = vmul.f32 %v1437_v37, %v1410_v40  ;;  %v1447_v7 = vmul.f32 %v1437_v37, %v1411_v43  ;;  %v1448_v48 = vmul.f32 %v1437_v37, %v1412_v45  ;;  %v1449_v50 = vmul.f32 %v1437_v37, %v1413_v49 }
 0x3a1   : > { %v1450_v14 = vmul.f32 %v1437_v37, %v1414_v51  ;;  %v1451_v52 = vmul.f32 %v1437_v37, %v1415_v55  ;;  %v1452_v25 = vmul.f32 %v1437_v37, %v1416_v57  ;;  %v1453_v18 = vmul.f32 %v1437_v37, %v1417_v61 }
 0x3a2   : > { %v1454_v54 = vmul.f32 %v1437_v37, %v1418_v63  ;;  %v1455_v58 = vmul.f32 %v1437_v37, %v1419_v3  ;;  %v1456_v10 = vmul.f32 %v1437_v37, %v1420_v5  ;;  %v1457_v59 = vmul.f32 %v1437_v37, %v1421_v9 }
 0x3a3   : > { %v1458_v0 = vmul.f32 %v1437_v37, %v1422_v11  ;;  %v1459_v8 = vmul.f32 %v1437_v37, %v1423_v15  ;;  %v1460_v39 = vmul.f32 %v1437_v37, %v1424_v17  ;;  %v1461_v6 = vmul.f32 %v1437_v37, %v1425_v21 }
 0x3a4   : > { %v1462_v12 = vmul.f32 %v1437_v37, %v1426_v23  ;;  %v1463_v13 = vmul.f32 %v1437_v37, %v1427_v27  ;;  %v1464_v16 = vmul.f32 %v1437_v37, %v1428_v29  ;;  %v1465_v20 = vmul.f32 %v1437_v37, %v1429_v33  ;;  %v4724_v33 = vld [vmem:[%s5220_s6] ss:$0 sm:$0xff] }
 0x3a5   : > { %v1466_v36 = vmul.f32 %v1437_v37, %v1430_v44  ;;  %v1467_v19 = vmul.f32 %v1437_v37, %v1431_v47  ;;  %v1468_v22 = vmul.f32 %v1437_v37, %v1432_v53  ;;  %v1469_v24 = vmul.f32 %v1437_v37, %v1433_v31 }
 0x3a6   : > { %v1477_v26 = vmul.f32 %v3158_v2, %v1438_v32  ;;  %v1478_v28 = vmul.f32 %v3158_v2, %v1439_v35  ;;  %v1479_v34 = vmul.f32 %v3158_v2, %v1440_v62  ;;  %v1480_v38 = vmul.f32 %v3158_v2, %v1441_v60 }
 0x3a7   : > { %v1481_v40 = vmul.f32 %v3158_v2, %v1442_v41  ;;  %v1482_v43 = vmul.f32 %v3158_v2, %v1443_v1  ;;  %v1483_v45 = vmul.f32 %v3158_v2, %v1444_v4  ;;  %v1484_v49 = vmul.f32 %v3158_v2, %v1445_v42 }
 0x3a8   : > { %v1485_v51 = vmul.f32 %v3158_v2, %v1446_v46  ;;  %v1486_v55 = vmul.f32 %v3158_v2, %v1447_v7  ;;  %v1487_v57 = vmul.f32 %v3158_v2, %v1448_v48  ;;  %v1488_v61 = vmul.f32 %v3158_v2, %v1449_v50 }
 0x3a9   : > { %v1489_v63 = vmul.f32 %v3158_v2, %v1450_v14  ;;  %v1490_v3 = vmul.f32 %v3158_v2, %v1451_v52  ;;  %v1491_v5 = vmul.f32 %v3158_v2, %v1452_v25  ;;  %v1492_v9 = vmul.f32 %v3158_v2, %v1453_v18 }
 0x3aa   : > { %v1493_v11 = vmul.f32 %v3158_v2, %v1454_v54  ;;  %v1494_v15 = vmul.f32 %v3158_v2, %v1455_v58  ;;  %v1495_v17 = vmul.f32 %v3158_v2, %v1456_v10  ;;  %v1496_v21 = vmul.f32 %v3158_v2, %v1457_v59 }
 0x3ab   : > { %v1497_v23 = vmul.f32 %v3158_v2, %v1458_v0  ;;  %v1498_v30 = vmul.f32 %v3158_v2, %v1459_v8  ;;  %v1499_v27 = vmul.f32 %v3158_v2, %v1460_v39  ;;  %v1500_v29 = vmul.f32 %v3158_v2, %v1461_v6  ;;  %v4726_v37 = vpop.f32.mrf.mxu0 }
 0x3ac   : > { %v1501_v44 = vmul.f32 %v3158_v2, %v1462_v12  ;;  %v1502_v47 = vmul.f32 %v3158_v2, %v1463_v13  ;;  %v1503_v53 = vmul.f32 %v3158_v2, %v1464_v16  ;;  %v1504_v31 = vmul.f32 %v3158_v2, %v1465_v20 }
 0x3ad   : > { %v1505_v56 = vmul.f32 %v3158_v2, %v1466_v36  ;;  %v1506_v32 = vmul.f32 %v3158_v2, %v1467_v19  ;;  %v1507_v35 = vmul.f32 %v3158_v2, %v1468_v22  ;;  %v1508_v62 = vmul.f32 %v3158_v2, %v1469_v24  ;;  %v4734_v60 = vpop.f32.mrf.mxu0  ;;  %v4795_v19 = vld [vmem:[%s5224_s10] ss:$0 sm:$0xff] }
 0x3ae   : > { %v1516_v41 = vadd.f32 %v4724_v33, %v1477_v26  ;;  %v1517_v1 = vadd.f32 %v4724_v33, %v1478_v28  ;;  %v1518_v4 = vadd.f32 %v4724_v33, %v1479_v34  ;;  %v1519_v42 = vadd.f32 %v4724_v33, %v1480_v38 }
 0x3af   : > { %v1520_v46 = vadd.f32 %v4724_v33, %v1481_v40  ;;  %v1521_v7 = vadd.f32 %v4724_v33, %v1482_v43  ;;  %v1522_v48 = vadd.f32 %v4724_v33, %v1483_v45  ;;  %v1523_v50 = vadd.f32 %v4724_v33, %v1484_v49  ;;  %v3713_v14 = vpop.f32.mrf.mxu0 }
 0x3b0   : > { %v1524_v52 = vadd.f32 %v4724_v33, %v1485_v51  ;;  %v1525_v25 = vadd.f32 %v4724_v33, %v1486_v55  ;;  %v1526_v18 = vadd.f32 %v4724_v33, %v1487_v57  ;;  %v1527_v54 = vadd.f32 %v4724_v33, %v1488_v61  ;;  %1548 = vst.msk [vmem:[%s4732_s30] sm:$0xff] %vm1093_vm2, %v1516_v41 }
 0x3b1   : > { %1549 = vst.msk [vmem:[%s4732_s30 + $0x8] sm:$0xff] %vm1093_vm2, %v1517_v1  ;;  %1550 = vst.msk [vmem:[%s4732_s30 + $0x10] sm:$0xff] %vm1093_vm2, %v1518_v4  ;;  %v1528_v58 = vadd.f32 %v4724_v33, %v1489_v63  ;;  %v1529_v10 = vadd.f32 %v4724_v33, %v1490_v3  ;;  %v1530_v59 = vadd.f32 %v4724_v33, %v1491_v5  ;;  %v2199_v8 = vpop.f32.mrf.mxu0 }
 0x3b2   : > { %1551 = vst.msk [vmem:[%s4732_s30 + $0x18] sm:$0xff] %vm1093_vm2, %v1519_v42  ;;  %v1531_v0 = vadd.f32 %v4724_v33, %v1492_v9  ;;  %1552 = vst.msk [vmem:[%s4732_s30 + $0x20] sm:$0xff] %vm1093_vm2, %v1520_v46  ;;  %v1532_v39 = vadd.f32 %v4724_v33, %v1493_v11  ;;  %v1533_v6 = vadd.f32 %v4724_v33, %v1494_v15  ;;  %v3934_v15 = vmov -3.9552622  }
 0x3b3   : > { %1553 = vst.msk [vmem:[%s4732_s30 + $0x28] sm:$0xff] %vm1093_vm2, %v1521_v7  ;;  %1554 = vst.msk [vmem:[%s4732_s30 + $0x30] sm:$0xff] %vm1093_vm2, %v1522_v48  ;;  %v1534_v2 = vadd.f32 %v4724_v33, %v1495_v17  ;;  %v1535_v12 = vadd.f32 %v4724_v33, %v1496_v21  ;;  %v1536_v13 = vadd.f32 %v4724_v33, %v1497_v23  ;;  %v3716_v22 = vpop.f32.mrf.mxu0 }
 0x3b4   : > { %1555 = vst.msk [vmem:[%s4732_s30 + $0x38] sm:$0xff] %vm1093_vm2, %v1523_v50  ;;  %1556 = vst.msk [vmem:[%s4732_s30 + $0x40] sm:$0xff] %vm1093_vm2, %v1524_v52  ;;  %v1537_v16 = vadd.f32 %v4724_v33, %v1498_v30  ;;  %v1538_v20 = vadd.f32 %v4724_v33, %v1499_v27  ;;  %v1539_v36 = vadd.f32 %v4724_v33, %v1500_v29 }
 0x3b5   : > { %1557 = vst.msk [vmem:[%s4732_s30 + $0x48] sm:$0xff] %vm1093_vm2, %v1525_v25  ;;  %1558 = vst.msk [vmem:[%s4732_s30 + $0x50] sm:$0xff] %vm1093_vm2, %v1526_v18  ;;  %v1540_v24 = vadd.f32 %v4724_v33, %v1501_v44  ;;  %v1541_v26 = vadd.f32 %v4724_v33, %v1502_v47  ;;  %v1542_v28 = vadd.f32 %v4724_v33, %v1503_v53  ;;  %v2209_v49 = vpop.f32.mrf.mxu0 }
 0x3b6   : > { %1559 = vst.msk [vmem:[%s4732_s30 + $0x58] sm:$0xff] %vm1093_vm2, %v1527_v54  ;;  %1560 = vst.msk [vmem:[%s4732_s30 + $0x60] sm:$0xff] %vm1093_vm2, %v1528_v58  ;;  %v1543_v34 = vadd.f32 %v4724_v33, %v1504_v31  ;;  %v1544_v38 = vadd.f32 %v4724_v33, %v1505_v56  ;;  %v1545_v40 = vadd.f32 %v4724_v33, %v1506_v32 }
 0x3b7   : > { %1561 = vst.msk [vmem:[%s4732_s30 + $0x68] sm:$0xff] %vm1093_vm2, %v1529_v10  ;;  %1562 = vst.msk [vmem:[%s4732_s30 + $0x70] sm:$0xff] %vm1093_vm2, %v1530_v59  ;;  %v1546_v43 = vadd.f32 %v4724_v33, %v1507_v35  ;;  %v1547_v45 = vadd.f32 %v4724_v33, %v1508_v62  ;;  %v2195_v51 = vadd.f32 %v4726_v37, %v4795_v19  ;;  %v3719_v5 = vpop.f32.mrf.mxu0 }
 0x3b8   : > { %1563 = vst.msk [vmem:[%s4732_s30 + $0x78] sm:$0xff] %vm1093_vm2, %v1531_v0  ;;  %1564 = vst.msk [vmem:[%s4732_s30 + $0x80] sm:$0xff] %vm1093_vm2, %v1532_v39  ;;  %v2190_v55 = vadd.f32 %v4795_v19, %v4734_v60  ;;  %v2205_v57 = vadd.f32 %v3713_v14, %v4795_v19  ;;  %v2200_v61 = vadd.f32 %v4795_v19, %v2199_v8 }
 0x3b9   : > { %1565 = vst.msk [vmem:[%s4732_s30 + $0x88] sm:$0xff] %vm1093_vm2, %v1533_v6  ;;  %1566 = vst.msk [vmem:[%s4732_s30 + $0x90] sm:$0xff] %vm1093_vm2, %v1534_v2  ;;  %v4850_v63 = vadd.f32 %v3716_v22, %v4795_v19  ;;  %v2210_v3 = vadd.f32 %v4795_v19, %v2209_v49  ;;  %v2381_v9 = vand.u32 2147483647, %v2195_v51  ;;  %vm2477_vm4 = vcmp.ge.f32.partialorder %v2195_v51, 0.0  ;;  %v2219_v27 = vpop.f32.mrf.mxu0 }
 0x3ba   : > { %1567 = vst.msk [vmem:[%s4732_s30 + $0x98] sm:$0xff] %vm1093_vm2, %v1535_v12  ;;  %1568 = vst.msk [vmem:[%s4732_s30 + $0xa0] sm:$0xff] %vm1093_vm2, %v1536_v13  ;;  %v2541_v11 = vmul.f32 6.850715e+12, %v2195_v51  ;;  %vm2479_vm5 = vcmp.ge.f32.partialorder %v2205_v57, 0.0  ;;  %v4869_v30 = vadd.f32 %v3719_v5, %v4795_v19  ;;  %v2220_v44 = vadd.f32 %v4795_v19, %v2219_v27 }
 0x3bb   : > { %1569 = vst.msk [vmem:[%s4732_s30 + $0xa8] sm:$0xff] %vm1093_vm2, %v1537_v16  ;;  %1570 = vst.msk [vmem:[%s4732_s30 + $0xb0] sm:$0xff] %vm1093_vm2, %v1538_v20  ;;  %v2509_v17 = vsel %vm2477_vm4, 3.9552622, %v3934_v15  ;;  %v2383_v21 = vand.u32 2147483647, %v2205_v57  ;;  %v3722_v31 = vpop.f32.mrf.mxu0 }
 0x3bc   : > { %1571 = vst.msk [vmem:[%s4732_s30 + $0xb8] sm:$0xff] %vm1093_vm2, %v1539_v36  ;;  %1572 = vst.msk [vmem:[%s4732_s30 + $0xc0] sm:$0xff] %vm1093_vm2, %v1540_v24  ;;  %v2511_v23 = vsel %vm2479_vm5, 3.9552622, %v3934_v15  ;;  %v2413_v29 = vmul.f32 1.7320508, %v2381_v9  ;;  %v4879_v35 = vadd.f32 %v3722_v31, %v4795_v19 }
 0x3bd   : > { %1573 = vst.msk [vmem:[%s4732_s30 + $0xc8] sm:$0xff] %vm1093_vm2, %v1541_v26  ;;  %1574 = vst.msk [vmem:[%s4732_s30 + $0xd0] sm:$0xff] %vm1093_vm2, %v1542_v28  ;;  %v2543_v33 = vmul.f32 6.850715e+12, %v2205_v57  ;;  %v2380_v37 = vand.u32 2147483647, %v2190_v55  ;;  %v2229_v1 = vpop.f32.mrf.mxu0 }
 0x3be   : > { %1575 = vst.msk [vmem:[%s4732_s30 + $0xd8] sm:$0xff] %vm1093_vm2, %v1543_v34  ;;  %1576 = vst.msk [vmem:[%s4732_s30 + $0xe0] sm:$0xff] %vm1093_vm2, %v1544_v38  ;;  %v2415_v47 = vmul.f32 1.7320508, %v2383_v21  ;;  %vm2476_vm6 = vcmp.ge.f32.partialorder %v2190_v55, 0.0  ;;  %vm2478_vm7 = vcmp.ge.f32.partialorder %v2200_v61, 0.0  ;;  %v2230_v46 = vadd.f32 %v4795_v19, %v2229_v1 }
 0x3bf   : > { %1577 = vst.msk [vmem:[%s4732_s30 + $0xe8] sm:$0xff] %vm1093_vm2, %v1545_v40  ;;  %1578 = vst.msk [vmem:[%s4732_s30 + $0xf0] sm:$0xff] %vm1093_vm2, %v1546_v43  ;;  %v2540_v53 = vmul.f32 6.850715e+12, %v2190_v55  ;;  %vm2445_vm8 = vcmp.gt.f32.partialorder %v2413_v29, 1e-12  ;;  %v3725_v14 = vpop.f32.mrf.mxu0 }
 0x3c0   : > { %1579 = vst.msk [vmem:[%s4732_s30 + $0xf8] sm:$0xff] %vm1093_vm2, %v1547_v45  ;;  %v2412_v56 = vmul.f32 1.7320508, %v2380_v37  ;;  %v2508_v32 = vsel %vm2476_vm6, 3.9552622, %v3934_v15  ;;  %v2573_v62 = vsel %vm2445_vm8, %v2509_v17, %v2541_v11  ;;  %vm2480_vm11 = vcmp.ge.f32.partialorder %v2210_v3, 0.0 }
 0x3c1   : > { %2349 = vst.msk [vmem:[%s4813_s17 + $0x8] sm:$0xff] %vm1251_vm3, %v2195_v51  ;;  %2348 = vst.msk [vmem:[%s4813_s17] sm:$0xff] %vm1251_vm3, %v2190_v55  ;;  %vm2447_vm9 = vcmp.gt.f32.partialorder %v2415_v47, 1e-12  ;;  %v2382_v60 = vand.u32 2147483647, %v2200_v61  ;;  %v4891_v18 = vadd.f32 %v3725_v14, %v4795_v19  ;;  %v2239_v10 = vpop.f32.mrf.mxu0 }
 0x3c2   : > { %2351 = vst.msk [vmem:[%s4813_s17 + $0x18] sm:$0xff] %vm1251_vm3, %v2205_v57  ;;  %2350 = vst.msk [vmem:[%s4813_s17 + $0x10] sm:$0xff] %vm1251_vm3, %v2200_v61  ;;  %v2510_v41 = vsel %vm2478_vm7, 3.9552622, %v3934_v15  ;;  %vm2444_vm10 = vcmp.gt.f32.partialorder %v2412_v56, 1e-12  ;;  %v2575_v42 = vsel %vm2447_vm9, %v2511_v23, %v2543_v33  ;;  %v2240_v6 = vadd.f32 %v4795_v19, %v2239_v10 }
 0x3c3   : > { %2353 = vst.msk [vmem:[%s4813_s17 + $0x28] sm:$0xff] %vm1251_vm3, %v4850_v63  ;;  %2352 = vst.msk [vmem:[%s4813_s17 + $0x20] sm:$0xff] %vm1251_vm3, %v2210_v3  ;;  %v2542_v4 = vmul.f32 6.850715e+12, %v2200_v61  ;;  %v2572_v7 = vsel %vm2444_vm10, %v2508_v32, %v2540_v53  ;;  %v2414_v48 = vmul.f32 1.7320508, %v2382_v60  ;;  %v3728_v13 = vpop.f32.mrf.mxu0 }
 0x3c4   : > { %2355 = vst.msk [vmem:[%s4813_s17 + $0x38] sm:$0xff] %vm1251_vm3, %v4869_v30  ;;  %2354 = vst.msk [vmem:[%s4813_s17 + $0x30] sm:$0xff] %vm1251_vm3, %v2220_v44  ;;  %v2384_v50 = vand.u32 2147483647, %v2210_v3  ;;  %3764 = vmatprep.mubr.msk.f32.mxu0 %vm1251_vm3, %v2572_v7  ;;  %v2512_v52 = vsel %vm2480_vm11, 3.9552622, %v3934_v15  ;;  %v4906_v36 = vadd.f32 %v3728_v13, %v4795_v19 }
 0x3c5   : > { %2357 = vst.msk [vmem:[%s4813_s17 + $0x48] sm:$0xff] %vm1251_vm3, %v4879_v35  ;;  %2356 = vst.msk [vmem:[%s4813_s17 + $0x40] sm:$0xff] %vm1251_vm3, %v2230_v46  ;;  %v2544_v25 = vmul.f32 6.850715e+12, %v2210_v3  ;;  %v2385_v54 = vand.u32 2147483647, %v4850_v63  ;;  %3765 = vmatmul.mubr.msk.f32.vlgmr.msra.gmra.mxu0 %vm1251_vm3, %v2573_v62  ;;  %v2249_v28 = vpop.f32.mrf.mxu0 }
 0x3c6   : > { %vm2446_vm12 = vcmp.gt.f32.partialorder %v2414_v48, 1e-12  ;;  %v2416_v58 = vmul.f32 1.7320508, %v2384_v50  ;;  %vm2481_vm13 = vcmp.ge.f32.partialorder %v4850_v63, 0.0  ;;  %vm2482_vm14 = vcmp.ge.f32.partialorder %v2220_v44, 0.0 }
 0x3c7   : > { %v2574_v59 = vsel %vm2446_vm12, %v2510_v41, %v2542_v4  ;;  %2359 = vst.msk [vmem:[%s4813_s17 + $0x58] sm:$0xff] %vm1251_vm3, %v4891_v18  ;;  %v2417_v0 = vmul.f32 1.7320508, %v2385_v54  ;;  %v2513_v8 = vsel %vm2481_vm13, 3.9552622, %v3934_v15  ;;  %2358 = vst.msk [vmem:[%s4813_s17 + $0x50] sm:$0xff] %vm1251_vm3, %v2240_v6  ;;  %v2250_v40 = vadd.f32 %v4795_v19, %v2249_v28  ;;  %v3731_v49 = vpop.f32.mrf.mxu0 }
 0x3c8   : > { %v2545_v39 = vmul.f32 6.850715e+12, %v4850_v63  ;;  %3767 = vmatprep.mubr.msk.f32.mxu1 %vm1251_vm3, %v2574_v59  ;;  %vm2448_vm15 = vcmp.gt.f32.partialorder %v2416_v58, 1e-12  ;;  %v2386_v2 = vand.u32 2147483647, %v2220_v44  ;;  %v4926_v63 = vadd.f32 %v3731_v49, %v4795_v19 }
 0x3c9   : > { %v2514_v12 = vsel %vm2482_vm14, 3.9552622, %v3934_v15  ;;  %3768 = vmatmul.mubr.msk.f32.vlgmr.msra.gmra.mxu1 %vm1251_vm3, %v2575_v42  ;;  %v2576_v16 = vsel %vm2448_vm15, %v2512_v52, %v2544_v25  ;;  %vm2449_vm0 = vcmp.gt.f32.partialorder %v2417_v0, 1e-12  ;;  %v2546_v20 = vmul.f32 6.850715e+12, %v2220_v44  ;;  %v2259_v9 = vpop.f32.mrf.mxu0 }
 0x3ca   : > { %3770 = vmatprep.mubr.msk.f32.mxu1 %vm1251_vm3, %v2576_v16  ;;  %v2577_v22 = vsel %vm2449_vm0, %v2513_v8, %v2545_v39  ;;  %v2418_v24 = vmul.f32 1.7320508, %v2386_v2  ;;  %v2387_v26 = vand.u32 2147483647, %v4869_v30  ;;  %vm2483_vm1 = vcmp.ge.f32.partialorder %v4869_v30, 0.0  ;;  %2361 = vst.msk [vmem:[%s4813_s17 + $0x68] sm:$0xff] %vm1251_vm3, %v4906_v36 }
 0x3cb   : > { %v2515_v34 = vsel %vm2483_vm1, 3.9552622, %v3934_v15  ;;  %v2547_v38 = vmul.f32 6.850715e+12, %v4869_v30  ;;  %v2388_v43 = vand.u32 2147483647, %v2230_v46  ;;  %v2260_v21 = vadd.f32 %v4795_v19, %v2259_v9  ;;  %v3734_v29 = vpop.f32.mrf.mxu0 }
 0x3cc   : > { %vm2450_vm2 = vcmp.gt.f32.partialorder %v2418_v24, 1e-12  ;;  %v2419_v45 = vmul.f32 1.7320508, %v2387_v26  ;;  %vm2484_vm4 = vcmp.ge.f32.partialorder %v2230_v46, 0.0  ;;  %vm2485_vm5 = vcmp.ge.f32.partialorder %v4879_v35, 0.0 }
 0x3cd   : > { %3771 = vmatmul.mubr.msk.f32.gmra.mxu1 %vm1251_vm3, %v2577_v22  ;;  %v2578_v51 = vsel %vm2450_vm2, %v2514_v12, %v2546_v20  ;;  %2360 = vst.msk [vmem:[%s4813_s17 + $0x60] sm:$0xff] %vm1251_vm3, %v2250_v40  ;;  %v2420_v55 = vmul.f32 1.7320508, %v2388_v43  ;;  %v2516_v57 = vsel %vm2484_vm4, 3.9552622, %v3934_v15  ;;  %2363 = vst.msk [vmem:[%s4813_s17 + $0x78] sm:$0xff] %vm1251_vm3, %v4926_v63  ;;  %v4940_v44 = vadd.f32 %v3734_v29, %v4795_v19  ;;  %v2269_v31 = vpop.f32.mrf.mxu0 }
 0x3ce   : > { %v2548_v61 = vmul.f32 6.850715e+12, %v2230_v46  ;;  %3773 = vmatprep.mubr.msk.f32.mxu1 %vm1251_vm3, %v2578_v51  ;;  %vm2451_vm6 = vcmp.gt.f32.partialorder %v2419_v45, 1e-12  ;;  %v2389_v3 = vand.u32 2147483647, %v4879_v35  ;;  %v2270_v60 = vadd.f32 %v4795_v19, %v2269_v31 }
 0x3cf   : > { %v2517_v5 = vsel %vm2485_vm5, 3.9552622, %v3934_v15  ;;  %v2579_v11 = vsel %vm2451_vm6, %v2515_v34, %v2547_v38  ;;  %vm2452_vm7 = vcmp.gt.f32.partialorder %v2420_v55, 1e-12  ;;  %v2549_v17 = vmul.f32 6.850715e+12, %v4879_v35  ;;  %v3737_v4 = vpop.f32.mrf.mxu0 }
 0x3d0   : > { %v2580_v23 = vsel %vm2452_vm7, %v2516_v57, %v2548_v61  ;;  %v2421_v30 = vmul.f32 1.7320508, %v2389_v3  ;;  %v2390_v27 = vand.u32 2147483647, %v2240_v6  ;;  %vm2486_vm8 = vcmp.ge.f32.partialorder %v2240_v6, 0.0  ;;  %2362 = vst.msk [vmem:[%s4813_s17 + $0x70] sm:$0xff] %vm1251_vm3, %v2260_v21 }
 0x3d1   : > { %3774 = vmatmul.mubr.msk.f32.gmra.mxu1 %vm1251_vm3, %v2579_v11  ;;  %v2518_v33 = vsel %vm2486_vm8, 3.9552622, %v3934_v15  ;;  %v2550_v37 = vmul.f32 6.850715e+12, %v2240_v6  ;;  %v2391_v47 = vand.u32 2147483647, %v4891_v18  ;;  %v4954_v7 = vadd.f32 %v3737_v4, %v4795_v19  ;;  %v2279_v52 = vpop.f32.mrf.mxu0 }
 0x3d2   : > { %3776 = vmatprep.mubr.msk.f32.mxu1 %vm1251_vm3, %v2580_v23  ;;  %vm2453_vm9 = vcmp.gt.f32.partialorder %v2421_v30, 1e-12  ;;  %v2422_v53 = vmul.f32 1.7320508, %v2390_v27  ;;  %vm2487_vm10 = vcmp.ge.f32.partialorder %v4891_v18, 0.0  ;;  %vm2488_vm11 = vcmp.ge.f32.partialorder %v2250_v40, 0.0 }
 0x3d3   : > { %v2581_v56 = vsel %vm2453_vm9, %v2517_v5, %v2549_v17  ;;  %2365 = vst.msk [vmem:[%s4813_s17 + $0x88] sm:$0xff] %vm1251_vm3, %v4940_v44  ;;  %v2423_v32 = vmul.f32 1.7320508, %v2391_v47  ;;  %v2519_v35 = vsel %vm2487_vm10, 3.9552622, %v3934_v15  ;;  %2364 = vst.msk [vmem:[%s4813_s17 + $0x80] sm:$0xff] %vm1251_vm3, %v2270_v60  ;;  %v2280_v54 = vadd.f32 %v4795_v19, %v2279_v52  ;;  %v3740_v59 = vpop.f32.mrf.mxu0 }
 0x3d4   : > { %v2551_v62 = vmul.f32 6.850715e+12, %v4891_v18  ;;  %vm2454_vm12 = vcmp.gt.f32.partialorder %v2422_v53, 1e-12  ;;  %v2392_v41 = vand.u32 2147483647, %v2250_v40  ;;  %v4974_v2 = vadd.f32 %v3740_v59, %v4795_v19 }
 0x3d5   : > { %v2520_v1 = vsel %vm2488_vm11, 3.9552622, %v3934_v15  ;;  %3777 = vmatmul.mubr.msk.f32.gmra.mxu1 %vm1251_vm3, %v2581_v56  ;;  %v2582_v42 = vsel %vm2454_vm12, %v2518_v33, %v2550_v37  ;;  %vm2455_vm13 = vcmp.gt.f32.partialorder %v2423_v32, 1e-12  ;;  %v2552_v46 = vmul.f32 6.850715e+12, %v2250_v40  ;;  %v2289_v16 = vpop.f32.mrf.mxu0 }
 0x3d6   : > { %3779 = vmatprep.mubr.msk.f32.mxu1 %vm1251_vm3, %v2582_v42  ;;  %v2583_v48 = vsel %vm2455_vm13, %v2519_v35, %v2551_v62  ;;  %v2424_v50 = vmul.f32 1.7320508, %v2392_v41  ;;  %v2393_v14 = vand.u32 2147483647, %v4906_v36  ;;  %vm2489_vm14 = vcmp.ge.f32.partialorder %v4906_v36, 0.0  ;;  %2367 = vst.msk [vmem:[%s4813_s17 + $0x98] sm:$0xff] %vm1251_vm3, %v4954_v7 }
 0x3d7   : > { %v2521_v25 = vsel %vm2489_vm14, 3.9552622, %v3934_v15  ;;  %v2553_v18 = vmul.f32 6.850715e+12, %v4906_v36  ;;  %v2394_v58 = vand.u32 2147483647, %v2260_v21  ;;  %v2290_v22 = vadd.f32 %v4795_v19, %v2289_v16  ;;  %v3743_v34 = vpop.f32.mrf.mxu0 }
 0x3d8   : > { %vm2456_vm15 = vcmp.gt.f32.partialorder %v2424_v50, 1e-12  ;;  %v2425_v10 = vmul.f32 1.7320508, %v2393_v14  ;;  %vm2490_vm0 = vcmp.ge.f32.partialorder %v2260_v21, 0.0  ;;  %vm2491_vm1 = vcmp.ge.f32.partialorder %v4926_v63, 0.0 }
 0x3d9   : > { %3780 = vmatmul.mubr.msk.f32.gmra.mxu1 %vm1251_vm3, %v2583_v48  ;;  %v2584_v0 = vsel %vm2456_vm15, %v2520_v1, %v2552_v46  ;;  %2366 = vst.msk [vmem:[%s4813_s17 + $0x90] sm:$0xff] %vm1251_vm3, %v2280_v54  ;;  %v2426_v8 = vmul.f32 1.7320508, %v2394_v58  ;;  %v2522_v39 = vsel %vm2490_vm0, 3.9552622, %v3934_v15  ;;  %2369 = vst.msk [vmem:[%s4813_s17 + $0xa8] sm:$0xff] %vm1251_vm3, %v4974_v2  ;;  %v4988_v43 = vadd.f32 %v3743_v34, %v4795_v19  ;;  %v2299_v51 = vpop.f32.mrf.mxu0 }
 0x3da   : > { %v2554_v6 = vmul.f32 6.850715e+12, %v2260_v21  ;;  %3782 = vmatprep.mubr.msk.f32.mxu1 %vm1251_vm3, %v2584_v0  ;;  %vm2457_vm2 = vcmp.gt.f32.partialorder %v2425_v10, 1e-12  ;;  %v2395_v12 = vand.u32 2147483647, %v4926_v63  ;;  %v2300_v3 = vadd.f32 %v4795_v19, %v2299_v51 }
 0x3db   : > { %v2523_v13 = vsel %vm2491_vm1, 3.9552622, %v3934_v15  ;;  %v2585_v20 = vsel %vm2457_vm2, %v2521_v25, %v2553_v18  ;;  %vm2458_vm4 = vcmp.gt.f32.partialorder %v2426_v8, 1e-12  ;;  %v2555_v36 = vmul.f32 6.850715e+12, %v4926_v63  ;;  %v3746_v11 = vpop.f32.mrf.mxu0 }
 0x3dc   : > { %v2586_v24 = vsel %vm2458_vm4, %v2522_v39, %v2554_v6  ;;  %v2427_v26 = vmul.f32 1.7320508, %v2395_v12  ;;  %v2396_v28 = vand.u32 2147483647, %v2270_v60  ;;  %vm2492_vm5 = vcmp.ge.f32.partialorder %v2270_v60, 0.0  ;;  %2368 = vst.msk [vmem:[%s4813_s17 + $0xa0] sm:$0xff] %vm1251_vm3, %v2290_v22 }
 0x3dd   : > { %3783 = vmatmul.mubr.msk.f32.gmra.mxu1 %vm1251_vm3, %v2585_v20  ;;  %v2524_v38 = vsel %vm2492_vm5, 3.9552622, %v3934_v15  ;;  %v2556_v40 = vmul.f32 6.850715e+12, %v2270_v60  ;;  %v2397_v45 = vand.u32 2147483647, %v4940_v44  ;;  %v5002_v23 = vadd.f32 %v3746_v11, %v4795_v19  ;;  %v2309_v29 = vpop.f32.mrf.mxu0 }
 0x3de   : > { %3785 = vmatprep.mubr.msk.f32.mxu1 %vm1251_vm3, %v2586_v24  ;;  %vm2459_vm6 = vcmp.gt.f32.partialorder %v2427_v26, 1e-12  ;;  %v2428_v49 = vmul.f32 1.7320508, %v2396_v28  ;;  %vm2493_vm7 = vcmp.ge.f32.partialorder %v4940_v44, 0.0  ;;  %vm2494_vm8 = vcmp.ge.f32.partialorder %v2280_v54, 0.0 }
 0x3df   : > { %v2587_v55 = vsel %vm2459_vm6, %v2523_v13, %v2555_v36  ;;  %2371 = vst.msk [vmem:[%s4813_s17 + $0xb8] sm:$0xff] %vm1251_vm3, %v4988_v43  ;;  %v2429_v57 = vmul.f32 1.7320508, %v2397_v45  ;;  %v2525_v61 = vsel %vm2493_vm7, 3.9552622, %v3934_v15  ;;  %2370 = vst.msk [vmem:[%s4813_s17 + $0xb0] sm:$0xff] %vm1251_vm3, %v2300_v3  ;;  %v3749_v31 = vpop.f32.mrf.mxu0 }
 0x3e0   : > { %v2557_v63 = vmul.f32 6.850715e+12, %v4940_v44  ;;  %vm2460_vm9 = vcmp.gt.f32.partialorder %v2428_v49, 1e-12  ;;  %v2398_v5 = vand.u32 2147483647, %v2280_v54  ;;  %v2310_v44 = vadd.f32 %v4795_v19, %v2309_v29 }
 0x3e1   : > { %v2526_v9 = vsel %vm2494_vm8, 3.9552622, %v3934_v15  ;;  %3786 = vmatmul.mubr.msk.f32.gmra.mxu1 %vm1251_vm3, %v2587_v55  ;;  %v2588_v17 = vsel %vm2460_vm9, %v2524_v38, %v2556_v40  ;;  %vm2461_vm10 = vcmp.gt.f32.partialorder %v2429_v57, 1e-12  ;;  %v2558_v21 = vmul.f32 6.850715e+12, %v2280_v54  ;;  %v2319_v4 = vpop.f32.mrf.mxu0 }
 0x3e2   : > { %3788 = vmatprep.mubr.msk.f32.mxu1 %vm1251_vm3, %v2588_v17  ;;  %v2430_v30 = vmul.f32 1.7320508, %v2398_v5  ;;  %v2399_v27 = vand.u32 2147483647, %v4954_v7  ;;  %vm2495_vm11 = vcmp.ge.f32.partialorder %v4954_v7, 0.0  ;;  %v2589_v33 = vsel %vm2461_vm10, %v2525_v61, %v2557_v63  ;;  %2373 = vst.msk [vmem:[%s4813_s17 + $0xc8] sm:$0xff] %vm1251_vm3, %v5002_v23 }
 0x3e3   : > { %v2527_v37 = vsel %vm2495_vm11, 3.9552622, %v3934_v15  ;;  %v2400_v47 = vand.u32 2147483647, %v2290_v22  ;;  %vm2496_vm13 = vcmp.ge.f32.partialorder %v2290_v22, 0.0  ;;  %vm2497_vm14 = vcmp.ge.f32.partialorder %v4974_v2, 0.0  ;;  %v3752_v52 = vpop.f32.mrf.mxu0 }
 0x3e4   : > { %vm2462_vm12 = vcmp.gt.f32.partialorder %v2430_v30, 1e-12  ;;  %v2431_v53 = vmul.f32 1.7320508, %v2399_v27  ;;  %v2559_v32 = vmul.f32 6.850715e+12, %v4954_v7  ;;  %v5022_v41 = vadd.f32 %v3749_v31, %v4795_v19 }
 0x3e5   : > { %3789 = vmatmul.mubr.msk.f32.gmra.mxu1 %vm1251_vm3, %v2589_v33  ;;  %v2590_v56 = vsel %vm2462_vm12, %v2526_v9, %v2558_v21  ;;  %2372 = vst.msk [vmem:[%s4813_s17 + $0xc0] sm:$0xff] %vm1251_vm3, %v2310_v44  ;;  %v2432_v35 = vmul.f32 1.7320508, %v2400_v47  ;;  %v2528_v62 = vsel %vm2496_vm13, 3.9552622, %v3934_v15  ;;  %v2320_v7 = vadd.f32 %v4795_v19, %v2319_v4  ;;  %v2329_v59 = vpop.f32.mrf.mxu0  ;;  %s3935_s30 = smov [#allocation2]  }
 0x3e6   : > { %3791 = vmatprep.mubr.msk.f32.mxu1 %vm1251_vm3, %v2590_v56  ;;  %vm2463_vm15 = vcmp.gt.f32.partialorder %v2431_v53, 1e-12  ;;  %v2560_v60 = vmul.f32 6.850715e+12, %v2290_v22  ;;  %v2401_v1 = vand.u32 2147483647, %v4974_v2  ;;  %v5036_v54 = vadd.f32 %v3752_v52, %v4795_v19 }
 0x3e7   : > { %v2591_v42 = vsel %vm2463_vm15, %v2527_v37, %v2559_v32  ;;  %vm2464_vm0 = vcmp.gt.f32.partialorder %v2432_v35, 1e-12  ;;  %v2529_v46 = vsel %vm2497_vm14, 3.9552622, %v3934_v15  ;;  %2375 = vst.msk [vmem:[%s4813_s17 + $0xd8] sm:$0xff] %vm1251_vm3, %v5022_v41  ;;  %vm2498_vm1 = vcmp.ge.f32.partialorder %v2300_v3, 0.0  ;;  %v3755_v16 = vpop.f32.mrf.mxu0 }
 0x3e8   : > { %v2592_v48 = vsel %vm2464_vm0, %v2528_v62, %v2560_v60  ;;  %v2433_v50 = vmul.f32 1.7320508, %v2401_v1  ;;  %v2402_v14 = vand.u32 2147483647, %v2300_v3  ;;  %v2561_v25 = vmul.f32 6.850715e+12, %v4974_v2 }
 0x3e9   : > { %3792 = vmatmul.mubr.msk.f32.gmra.mxu1 %vm1251_vm3, %v2591_v42  ;;  %2374 = vst.msk [vmem:[%s4813_s17 + $0xd0] sm:$0xff] %vm1251_vm3, %v2320_v7  ;;  %v2530_v18 = vsel %vm2498_vm1, 3.9552622, %v3934_v15  ;;  %v2403_v58 = vand.u32 2147483647, %v4988_v43  ;;  %vm2499_vm4 = vcmp.ge.f32.partialorder %v4988_v43, 0.0  ;;  %v2330_v12 = vadd.f32 %v4795_v19, %v2329_v59  ;;  %v2339_v28 = vpop.f32.mrf.mxu0 }
 0x3ea   : > { %3794 = vmatprep.mubr.msk.f32.mxu1 %vm1251_vm3, %v2592_v48  ;;  %vm2465_vm2 = vcmp.gt.f32.partialorder %v2433_v50, 1e-12  ;;  %v2434_v10 = vmul.f32 1.7320508, %v2402_v14  ;;  %vm2500_vm5 = vcmp.ge.f32.partialorder %v2310_v44, 0.0  ;;  %2377 = vst.msk [vmem:[%s4813_s17 + $0xe8] sm:$0xff] %vm1251_vm3, %v5036_v54  ;;  %v5050_v22 = vadd.f32 %v3755_v16, %v4795_v19 }
 0x3eb   : > { %v2593_v0 = vsel %vm2465_vm2, %v2529_v46, %v2561_v25  ;;  %v2562_v8 = vmul.f32 6.850715e+12, %v2300_v3  ;;  %v2435_v39 = vmul.f32 1.7320508, %v2403_v58  ;;  %v2531_v6 = vsel %vm2499_vm4, 3.9552622, %v3934_v15 }
 0x3ec   : > { %vm2466_vm6 = vcmp.gt.f32.partialorder %v2434_v10, 1e-12  ;;  %v2563_v2 = vmul.f32 6.850715e+12, %v4988_v43  ;;  %v2404_v13 = vand.u32 2147483647, %v2310_v44  ;;  %v2340_v40 = vadd.f32 %v4795_v19, %v2339_v28 }
 0x3ed   : > { %3795 = vmatmul.mubr.msk.f32.gmra.mxu1 %vm1251_vm3, %v2593_v0  ;;  %v2594_v20 = vsel %vm2466_vm6, %v2530_v18, %v2562_v8  ;;  %vm2467_vm7 = vcmp.gt.f32.partialorder %v2435_v39, 1e-12  ;;  %v2532_v36 = vsel %vm2500_vm5, 3.9552622, %v3934_v15  ;;  %2376 = vst.msk [vmem:[%s4813_s17 + $0xe0] sm:$0xff] %vm1251_vm3, %v2330_v12  ;;  %vm2501_vm8 = vcmp.ge.f32.partialorder %v5002_v23, 0.0 }
 0x3ee   : > { %3797 = vmatprep.mubr.msk.f32.mxu1 %vm1251_vm3, %v2594_v20  ;;  %v2436_v24 = vmul.f32 1.7320508, %v2404_v13  ;;  %v2405_v26 = vand.u32 2147483647, %v5002_v23  ;;  %v2564_v34 = vmul.f32 6.850715e+12, %v2310_v44  ;;  %v2595_v45 = vsel %vm2467_vm7, %v2531_v6, %v2563_v2 }
 0x3ef   : > { %2379 = vst.msk [vmem:[%s4813_s17 + $0xf8] sm:$0xff] %vm1251_vm3, %v5050_v22  ;;  %v2533_v38 = vsel %vm2501_vm8, 3.9552622, %v3934_v15  ;;  %v2406_v43 = vand.u32 2147483647, %v2320_v7  ;;  %vm2502_vm10 = vcmp.ge.f32.partialorder %v2320_v7, 0.0 }
 0x3f0   : > { %vm2468_vm9 = vcmp.gt.f32.partialorder %v2436_v24, 1e-12  ;;  %v2437_v49 = vmul.f32 1.7320508, %v2405_v26  ;;  %v2565_v55 = vmul.f32 6.850715e+12, %v5002_v23 }
 0x3f1   : > { %3798 = vmatmul.mubr.msk.f32.gmra.mxu1 %vm1251_vm3, %v2595_v45  ;;  %v2596_v51 = vsel %vm2468_vm9, %v2532_v36, %v2564_v34  ;;  %2378 = vst.msk [vmem:[%s4813_s17 + $0xf0] sm:$0xff] %vm1251_vm3, %v2340_v40  ;;  %v2438_v57 = vmul.f32 1.7320508, %v2406_v43  ;;  %vm2503_vm11 = vcmp.ge.f32.partialorder %v5022_v41, 0.0  ;;  %v2566_v61 = vmul.f32 6.850715e+12, %v2320_v7 }
 0x3f2   : > { %3800 = vmatprep.mubr.msk.f32.mxu1 %vm1251_vm3, %v2596_v51  ;;  %vm2469_vm12 = vcmp.gt.f32.partialorder %v2437_v49, 1e-12  ;;  %v2407_v19 = vand.u32 2147483647, %v5022_v41  ;;  %v2534_v63 = vsel %vm2502_vm10, 3.9552622, %v3934_v15 }
 0x3f3   : > { %vm2470_vm13 = vcmp.gt.f32.partialorder %v2438_v57, 1e-12  ;;  %v2408_v3 = vand.u32 2147483647, %v2330_v12  ;;  %v2597_v5 = vsel %vm2469_vm12, %v2533_v38, %v2565_v55  ;;  %vm2504_vm14 = vcmp.ge.f32.partialorder %v2330_v12, 0.0  ;;  %s3872_s27 = sshll.u32 %s3935_s30, 4  ;;  %s3873_s27 = int_to_ptr.vmem [resolvable:$false] %s3872_s27 }
 0x3f4   : > { %v2598_v9 = vsel %vm2470_vm13, %v2534_v63, %v2566_v61  ;;  %v2439_v11 = vmul.f32 1.7320508, %v2407_v19  ;;  %v2535_v17 = vsel %vm2503_vm11, 3.9552622, %v3934_v15  ;;  %v2409_v23 = vand.u32 2147483647, %v5036_v54  ;;  %p3875_p0 = scmp.lt.s32.totalorder %s5167_s16, %s3873_s27 }
 0x3f5   : > { %3801 = vmatmul.mubr.msk.f32.gmra.mxu1 %vm1251_vm3, %v2597_v5  ;;  %v2440_v21 = vmul.f32 1.7320508, %v2408_v3  ;;  %v2567_v30 = vmul.f32 6.850715e+12, %v5022_v41  ;;  %v2568_v27 = vmul.f32 6.850715e+12, %v2330_v12 }
 0x3f6   : > { %3803 = vmatprep.mubr.msk.f32.mxu1 %vm1251_vm3, %v2598_v9  ;;  %vm2471_vm15 = vcmp.gt.f32.partialorder %v2439_v11, 1e-12  ;;  %v2536_v29 = vsel %vm2504_vm14, 3.9552622, %v3934_v15  ;;  %v2441_v33 = vmul.f32 1.7320508, %v2409_v23 }
 0x3f7   : > { %vm2472_vm0 = vcmp.gt.f32.partialorder %v2440_v21, 1e-12  ;;  %v2599_v37 = vsel %vm2471_vm15, %v2535_v17, %v2567_v30  ;;  %vm2505_vm1 = vcmp.ge.f32.partialorder %v5036_v54, 0.0  ;;  %v2410_v47 = vand.u32 2147483647, %v2340_v40  ;;  %s3874_s0 = scalar_lea.vmem %s3873_s27, 8192 }
 0x3f8   : > { %v2600_v44 = vsel %vm2472_vm0, %v2536_v29, %v2568_v27  ;;  %vm2473_vm2 = vcmp.gt.f32.partialorder %v2441_v33, 1e-12  ;;  %vm2506_vm4 = vcmp.ge.f32.partialorder %v2340_v40, 0.0  ;;  %v2411_v53 = vand.u32 2147483647, %v5050_v22  ;;  %p3876_p1 = scmp.lt.s32.totalorder %s3874_s0, %s3868_s25 }
 0x3f9   : > { %3804 = vmatmul.mubr.msk.f32.gmra.mxu1 %vm1251_vm3, %v2599_v37  ;;  %v2569_v31 = vmul.f32 6.850715e+12, %v5036_v54  ;;  %v2442_v56 = vmul.f32 1.7320508, %v2410_v47  ;;  %v2537_v32 = vsel %vm2505_vm1, 3.9552622, %v3934_v15 }
 0x3fa   : > { %3806 = vmatprep.mubr.msk.f32.mxu1 %vm1251_vm3, %v2600_v44  ;;  %v2570_v35 = vmul.f32 6.850715e+12, %v2340_v40  ;;  %v2443_v62 = vmul.f32 1.7320508, %v2411_v53  ;;  %v2538_v41 = vsel %vm2506_vm4, 3.9552622, %v3934_v15  ;;  %p3877_p2 = por %p3876_p1, %p3875_p0 }
 0x3fb   : > { %v2601_v60 = vsel %vm2473_vm2, %v2537_v32, %v2569_v31  ;;  %vm2474_vm5 = vcmp.gt.f32.partialorder %v2442_v56, 1e-12  ;;  %vm2507_vm6 = vcmp.ge.f32.partialorder %v5050_v22, 0.0  ;;  %v2571_v4 = vmul.f32 6.850715e+12, %v5050_v22 }
 0x3fc   : > { %v2602_v1 = vsel %vm2474_vm5, %v2538_v41, %v2570_v35  ;;  %vm2475_vm7 = vcmp.gt.f32.partialorder %v2443_v62, 1e-12  ;;  %v2539_v42 = vsel %vm2507_vm6, 3.9552622, %v3934_v15  ;;  %v5095_v7 = vld [vmem:[%s5226_s12] ss:$0 sm:$0xff]  ;;  %p3878_p3 = pnand %p3877_p2, %p3871_p13 }
 0x3fd   : > { %3807 = vmatmul.mubr.msk.f32.gmra.mxu1 %vm1251_vm3, %v2601_v60  ;;  %v2603_v46 = vsel %vm2475_vm7, %v2539_v42, %v2571_v4 }
 0x3fe   : > { %3809 = vmatprep.mubr.msk.f32.mxu1 %vm1251_vm3, %v2602_v1 }
 0x401   : > { %3810 = vmatmul.mubr.msk.f32.gmra.mxu1 %vm1251_vm3, %v2603_v46 }
 0x485   : > { %v3766_v48 = vpop.f32.mrf.mxu0 }
 0x486   : > { %v2783_v50 = vadd.f32 %v3766_v48, %v5095_v7 }
 0x487   : > { %v2777_v14 = vpop.f32.mrf.mxu0 }
 0x488   : > { %2937 = vst [vmem:[%s5098_s20 + $0x8] sm:$0xff] %v2783_v50  ;;  %v2778_v15 = vadd.f32 %v5095_v7, %v2777_v14 }
 0x489   : > { %v3769_v52 = vpop.f32.mrf.mxu1 }
 0x48a   : > { %v2793_v25 = vadd.f32 %v3769_v52, %v5095_v7  ;;  %2936 = vst [vmem:[%s5098_s20] sm:$0xff] %v2778_v15 }
 0x48b   : > { %v2787_v18 = vpop.f32.mrf.mxu1 }
 0x48c   : > { %2939 = vst [vmem:[%s5098_s20 + $0x18] sm:$0xff] %v2793_v25  ;;  %v2788_v54 = vadd.f32 %v5095_v7, %v2787_v18 }
 0x48d   : > { %v3772_v58 = vpop.f32.mrf.mxu1 }
 0x48e   : > { %2938 = vst [vmem:[%s5098_s20 + $0x10] sm:$0xff] %v2788_v54  ;;  %v2803_v10 = vadd.f32 %v3772_v58, %v5095_v7 }
 0x48f   : > { %v2797_v59 = vpop.f32.mrf.mxu1 }
 0x490   : > { %2941 = vst [vmem:[%s5098_s20 + $0x28] sm:$0xff] %v2803_v10  ;;  %v2798_v0 = vadd.f32 %v5095_v7, %v2797_v59 }
 0x491   : > { %v3775_v8 = vpop.f32.mrf.mxu1 }
 0x492   : > { %2940 = vst [vmem:[%s5098_s20 + $0x20] sm:$0xff] %v2798_v0  ;;  %v2813_v39 = vadd.f32 %v3775_v8, %v5095_v7 }
 0x493   : > { %v2807_v6 = vpop.f32.mrf.mxu1 }
 0x494   : > { %2943 = vst [vmem:[%s5098_s20 + $0x38] sm:$0xff] %v2813_v39  ;;  %v2808_v2 = vadd.f32 %v5095_v7, %v2807_v6 }
 0x495   : > { %v3778_v12 = vpop.f32.mrf.mxu1 }
 0x496   : > { %2942 = vst [vmem:[%s5098_s20 + $0x30] sm:$0xff] %v2808_v2  ;;  %v2823_v13 = vadd.f32 %v3778_v12, %v5095_v7 }
 0x497   : > { %v2817_v16 = vpop.f32.mrf.mxu1 }
 0x498   : > { %2945 = vst [vmem:[%s5098_s20 + $0x48] sm:$0xff] %v2823_v13  ;;  %v2818_v20 = vadd.f32 %v5095_v7, %v2817_v16 }
 0x499   : > { %v3781_v36 = vpop.f32.mrf.mxu1 }
 0x49a   : > { %2944 = vst [vmem:[%s5098_s20 + $0x40] sm:$0xff] %v2818_v20  ;;  %v2833_v22 = vadd.f32 %v3781_v36, %v5095_v7 }
 0x49b   : > { %v2827_v24 = vpop.f32.mrf.mxu1 }
 0x49c   : > { %2947 = vst [vmem:[%s5098_s20 + $0x58] sm:$0xff] %v2833_v22  ;;  %v2828_v26 = vadd.f32 %v5095_v7, %v2827_v24 }
 0x49d   : > { %v3784_v28 = vpop.f32.mrf.mxu1 }
 0x49e   : > { %2946 = vst [vmem:[%s5098_s20 + $0x50] sm:$0xff] %v2828_v26  ;;  %v2843_v34 = vadd.f32 %v3784_v28, %v5095_v7 }
 0x49f   : > { %v2837_v38 = vpop.f32.mrf.mxu1 }
 0x4a0   : > { %2949 = vst [vmem:[%s5098_s20 + $0x68] sm:$0xff] %v2843_v34  ;;  %v2838_v40 = vadd.f32 %v5095_v7, %v2837_v38 }
 0x4a1   : > { %v3787_v43 = vpop.f32.mrf.mxu1 }
 0x4a2   : > { %2948 = vst [vmem:[%s5098_s20 + $0x60] sm:$0xff] %v2838_v40  ;;  %v2853_v45 = vadd.f32 %v3787_v43, %v5095_v7 }
 0x4a3   : > { %v2847_v49 = vpop.f32.mrf.mxu1 }
 0x4a4   : > { %2951 = vst [vmem:[%s5098_s20 + $0x78] sm:$0xff] %v2853_v45  ;;  %v2848_v51 = vadd.f32 %v5095_v7, %v2847_v49 }
 0x4a5   : > { %v3790_v55 = vpop.f32.mrf.mxu1 }
 0x4a6   : > { %2950 = vst [vmem:[%s5098_s20 + $0x70] sm:$0xff] %v2848_v51  ;;  %v2863_v57 = vadd.f32 %v3790_v55, %v5095_v7 }
 0x4a7   : > { %v2857_v61 = vpop.f32.mrf.mxu1 }
 0x4a8   : > { %2953 = vst [vmem:[%s5098_s20 + $0x88] sm:$0xff] %v2863_v57  ;;  %v2858_v19 = vadd.f32 %v5095_v7, %v2857_v61 }
 0x4a9   : > { %v3793_v63 = vpop.f32.mrf.mxu1 }
 0x4aa   : > { %2952 = vst [vmem:[%s5098_s20 + $0x80] sm:$0xff] %v2858_v19  ;;  %v2873_v3 = vadd.f32 %v3793_v63, %v5095_v7 }
 0x4ab   : > { %v2867_v5 = vpop.f32.mrf.mxu1 }
 0x4ac   : > { %2955 = vst [vmem:[%s5098_s20 + $0x98] sm:$0xff] %v2873_v3  ;;  %v2868_v9 = vadd.f32 %v5095_v7, %v2867_v5 }
 0x4ad   : > { %v3796_v11 = vpop.f32.mrf.mxu1 }
 0x4ae   : > { %2954 = vst [vmem:[%s5098_s20 + $0x90] sm:$0xff] %v2868_v9  ;;  %v2883_v17 = vadd.f32 %v3796_v11, %v5095_v7 }
 0x4af   : > { %v2877_v21 = vpop.f32.mrf.mxu1 }
 0x4b0   : > { %2957 = vst [vmem:[%s5098_s20 + $0xa8] sm:$0xff] %v2883_v17  ;;  %v2878_v23 = vadd.f32 %v5095_v7, %v2877_v21 }
 0x4b1   : > { %v3799_v30 = vpop.f32.mrf.mxu1 }
 0x4b2   : > { %2956 = vst [vmem:[%s5098_s20 + $0xa0] sm:$0xff] %v2878_v23  ;;  %v2893_v27 = vadd.f32 %v3799_v30, %v5095_v7 }
 0x4b3   : > { %v2887_v29 = vpop.f32.mrf.mxu1 }
 0x4b4   : > { %2959 = vst [vmem:[%s5098_s20 + $0xb8] sm:$0xff] %v2893_v27  ;;  %v2888_v33 = vadd.f32 %v5095_v7, %v2887_v29 }
 0x4b5   : > { %v3802_v37 = vpop.f32.mrf.mxu1 }
 0x4b6   : > { %2958 = vst [vmem:[%s5098_s20 + $0xb0] sm:$0xff] %v2888_v33  ;;  %v2903_v44 = vadd.f32 %v3802_v37, %v5095_v7 }
 0x4b7   : > { %v2897_v47 = vpop.f32.mrf.mxu1 }
 0x4b8   : > { %2961 = vst [vmem:[%s5098_s20 + $0xc8] sm:$0xff] %v2903_v44  ;;  %v2898_v53 = vadd.f32 %v5095_v7, %v2897_v47 }
 0x4b9   : > { %v3805_v31 = vpop.f32.mrf.mxu1 }
 0x4ba   : > { %2960 = vst [vmem:[%s5098_s20 + $0xc0] sm:$0xff] %v2898_v53  ;;  %v2913_v56 = vadd.f32 %v3805_v31, %v5095_v7 }
 0x4bb   : > { %v2907_v32 = vpop.f32.mrf.mxu1 }
 0x4bc   : > { %2963 = vst [vmem:[%s5098_s20 + $0xd8] sm:$0xff] %v2913_v56  ;;  %v2908_v35 = vadd.f32 %v5095_v7, %v2907_v32 }
 0x4bd   : > { %v3808_v62 = vpop.f32.mrf.mxu1 }
 0x4be   : > { %2962 = vst [vmem:[%s5098_s20 + $0xd0] sm:$0xff] %v2908_v35  ;;  %v2923_v60 = vadd.f32 %v3808_v62, %v5095_v7 }
 0x4bf   : > { %v2917_v41 = vpop.f32.mrf.mxu1 }
 0x4c0   : > { %2965 = vst [vmem:[%s5098_s20 + $0xe8] sm:$0xff] %v2923_v60  ;;  %v2918_v1 = vadd.f32 %v5095_v7, %v2917_v41 }
 0x4c1   : > { %v3811_v4 = vpop.f32.mrf.mxu1 }
 0x4c2   : > { %2964 = vst [vmem:[%s5098_s20 + $0xe0] sm:$0xff] %v2918_v1  ;;  %v2933_v42 = vadd.f32 %v3811_v4, %v5095_v7 }
 0x4c3   : > { %v2927_v46 = vpop.f32.mrf.mxu1 }
 0x4c4   : > { %2967 = vst [vmem:[%s5098_s20 + $0xf8] sm:$0xff] %v2933_v42  ;;  %v2928_v48 = vadd.f32 %v5095_v7, %v2927_v46 }
 0x4c6   : > { %2966 = vst [vmem:[%s5098_s20 + $0xf0] sm:$0xff] %v2928_v48 }
 0x4c7   : > { %3881 = shalt.err (!%p3878_p3)
}
 0x4c8   : > { %s3882_s26 = scalar_lea.hbm %s5165_s23, 4096  ;;  %s3886_s30 = scalar_lea.hbm %s5229_s15, 8192 }
 0x4c9   : > { %p3883_p4 = scmp.ne.s32.totalorder %s5165_s23, %s3882_s26  ;;  %p3887_p9 = scmp.lt.s32.totalorder %s5165_s23, %s5229_s15 }
 0x4ca   : > { %p3888_p10 = scmp.lt.s32.totalorder %s3886_s30, %s3882_s26 }
 0x4cb   : > { %p3884_p7 = pnand %p3883_p4, %p4056_p5 }
 0x4cc   : > { %p3889_p11 = por %p3888_p10, %p3887_p9 }
 0x4cd   : > { %p3885_p8 = pneg %p3884_p7 }
 0x4cf   : > { %p3890_p12 = pnand %p3889_p11, %p3885_p8 }
 0x4d1   : > { %3893 = shalt.err (!%p3890_p12)
}
 0x4d2   : > { %s3936_s25 = smov 128   ;;  %s3937_s27 = smov 8  }
 0x4d3   : > { %3820 = dma.vmem_to_hbm [thread:$0]  (%p4056_p5), %s5167_s16, 4096, %s5165_s23, %s5174_s22, %s3936_s25, %s3936_s25, %s3937_s27  }
 0x4d4 PF: > { %p3826_p13 = scmp.ge.s32.totalorder %s3928_s21, 2  ;;  %s3029_s0 = sand.u32 1, %s3916_s18  }
 0x4d5   : > { %s3030_s1 = scalar_lea.sflag [#allocation3], %s3029_s0 }
 0x4d6   : > { %p3823_p0 = pnand %p3826_p13, %p4060_p6 }
 0x4d8   : > { %p3824_p1 = pneg %p3823_p0 }
 0x4da   : > { %3911 = dma.done.wait (%p3824_p1), %s3030_s1, 4096  }
 0x4db   : > { %3913 = vsyncadd (%p3824_p1), %s3030_s1, 4294963200  ;;  %s5241_s2 = sld [smem:[#allocation5_spill]]  ;;  %p26_p2 = scmp.ge.s32.totalorder %s4043_s24, 4  }
 0x4dc   : > { %s5242_s20 = sld [smem:[#allocation6_spill]]  ;;  %s5243_s18 = smov %s3920_s19 }
 0x4dd   : > { %s5245_s21 = smov %s4043_s24  ;;  %28 = sbr.rel (!%p26_p2) target bundleno = 7 (0x7), region = 131 }
 0x4e1   : > { %s5244_s19 = smov %s5241_s2 }
 0x4e2   :  { %3035 = vsyncpa [#allocation3], 1 }
 0x4e3   :  { %3037 = vsyncpa [#allocation3 + $0x1], 1 }

</bundles_post_ra>
